<compile_context>
chip_gen: v7x
topology: tpu7x:2x2x1
jax: 0.10.0
libtpu: 0.0.40
codegen_flags: <defaults>
</compile_context>

<pallas_src>
import jax
import jax.numpy as jnp
from jax.experimental import pallas as pl
from jax.experimental.pallas import tpu as pltpu

LANES = 128
MAX_BLOCK_ROWS = 2048   # (2048,128) bf16 tile = 512 KiB, f32 = 1 MiB


def _round_up(v, m):
    return (v + m - 1) // m * m


# --------------------------------------------------------------------------
# Fused Pallas kernel: loss = sum_l (1/n_l) * sum(|x_l - y_l|), one launch.
# --------------------------------------------------------------------------
def _emit_level_accum(o_ref, x_ref, y_ref, step, cfg):
    """Accumulate scale * sum(|x - y|) of this level's current block."""
    off = cfg["off"]
    nblk = cfg["nblk"]
    block_rows = cfg["block_rows"]
    rows = cfg["rows"]
    scale = jnp.float32(cfg["scale"])
    rem = rows - (nblk - 1) * block_rows      # real rows in last block (static)

    def _abs_diff():
        # Upcast in-kernel: bf16 inputs stream at half the HBM bytes.
        return jnp.abs(x_ref[...].astype(jnp.float32) -
                       y_ref[...].astype(jnp.float32))

    def _full():
        o_ref[...] += jnp.sum(_abs_diff(), axis=0, keepdims=True) * scale

    def _ragged():
        d = _abs_diff()
        rid = jax.lax.broadcasted_iota(jnp.int32, d.shape, 0)
        d = jnp.where(rid < rem, d, jnp.float32(0.0))
        o_ref[...] += jnp.sum(d, axis=0, keepdims=True) * scale

    active = jnp.logical_and(step >= off, step < off + nblk)
    if rem == block_rows:          # every block of this level is full
        pl.when(active)(_full)
    elif nblk == 1:                # single ragged block
        pl.when(active)(_ragged)
    else:                          # full blocks + one ragged tail block
        blk = step - off
        pl.when(jnp.logical_and(active, blk < nblk - 1))(_full)
        pl.when(jnp.logical_and(active, blk == nblk - 1))(_ragged)


def _build_fused_l1_kernel(level_cfgs):
    n_levels = len(level_cfgs)

    def kernel(*refs):
        o_ref = refs[2 * n_levels]     # inputs first, then the single output
        step = pl.program_id(0)

        @pl.when(step == 0)
        def _():
            o_ref[...] = jnp.zeros_like(o_ref)

        for lvl, cfg in enumerate(level_cfgs):
            _emit_level_accum(o_ref, refs[2 * lvl], refs[2 * lvl + 1], step, cfg)

    return kernel


def fused_l1_mean_sum(pairs):
    """sum_l mean(|x_l - y_l|) over a list of (x, y) pairs — ONE pallas_call.

    Each level streams as a lane-aligned (rows, 128) view.  A (1, 128) f32
    output block stays VMEM-resident across the whole grid and accumulates
    per-level block sums pre-scaled by 1/n_l; the wrapper sums the lanes.
    """
    level_cfgs, flat_inputs, in_specs = [], [], []
    off = 0
    total_n = 0
    total_bytes = 0
    for x, y in pairs:
        assert x.shape == y.shape and x.dtype == y.dtype
        n = x.size
        xf = x.reshape(-1)
        yf = y.reshape(-1)
        if n % LANES:      # rare ragged-lane fallback; |0-0| pads add nothing
            pad = LANES - n % LANES
            xf = jnp.pad(xf, (0, pad))
            yf = jnp.pad(yf, (0, pad))
        rows = xf.size // LANES
        xf = xf.reshape(rows, LANES)   # free reshape of a contiguous tensor
        yf = yf.reshape(rows, LANES)

        nblk = pl.cdiv(rows, MAX_BLOCK_ROWS)
        if nblk == 1:
            block_rows = rows                      # full-dim block: always legal
        else:
            # Balanced blocks, multiple of 16 sublanes (safe for bf16 packing);
            # at most the last block is ragged, never a fully-phantom block.
            block_rows = _round_up(pl.cdiv(rows, nblk), 16)
            nblk = pl.cdiv(rows, block_rows)

        def index_map(i, _off=off, _nblk=nblk):
            # Clamped + monotone: inactive levels pin their last-used block so
            # the pipeline never re-fetches an already-resident block.
            return (jnp.clip(i - _off, 0, _nblk - 1), 0)

        spec = pl.BlockSpec((block_rows, LANES), index_map)
        in_specs += [spec, spec]
        flat_inputs += [xf, yf]
        level_cfgs.append(dict(off=off, nblk=nblk, block_rows=block_rows,
                               rows=rows, scale=1.0 / n))
        off += nblk
        total_n += n
        total_bytes += 2 * n * jnp.dtype(x.dtype).itemsize

    kernel = _build_fused_l1_kernel(level_cfgs)

    out = pl.pallas_call(
        kernel,
        out_shape=jax.ShapeDtypeStruct((1, LANES), jnp.float32),
        grid_spec=pltpu.PrefetchScalarGridSpec(
            num_scalar_prefetch=0,
            grid=(off,),
            in_specs=in_specs,
            out_specs=pl.BlockSpec((1, LANES), lambda i: (0, 0)),
        ),
        compiler_params=pltpu.CompilerParams(
            dimension_semantics=("arbitrary",),
            vmem_limit_bytes=32 * 1024 * 1024,
        ),
        cost_estimate=pl.CostEstimate(
            flops=4 * total_n,
            transcendentals=0,
            bytes_accessed=total_bytes + LANES * 4,
        ),
    )(*flat_inputs)
    return jnp.sum(out)


# --------------------------------------------------------------------------
# Encoder3D feature extractor (plain JAX; frozen random weights, as in the
# PyTorch module, which uses an un-pretrained Encoder with requires_grad=False)
# --------------------------------------------------------------------------
def _conv3d(x, w, b=None):
    out = jax.lax.conv_general_dilated(
        x, w, window_strides=(1, 1, 1), padding="SAME",
        dimension_numbers=("NCDHW", "OIDHW", "NCDHW"))
    if b is not None:
        out = out + b.reshape(1, -1, 1, 1, 1)
    return out


def _prelu(x, a):
    return jnp.where(x >= 0, x, a * x)


def _ca_layer(x, w_down, w_up):
    y = jnp.mean(x, axis=(2, 3, 4), keepdims=True)   # AdaptiveAvgPool3d(1)
    y = jax.nn.relu(_conv3d(y, w_down))
    y = jax.nn.sigmoid(_conv3d(y, w_up))
    return x * y


def _cab(x, p, prelu_a):
    r = _conv3d(x, p["w1"])
    r = _prelu(r, prelu_a)
    r = _conv3d(r, p["w2"])
    r = _ca_layer(r, p["ca_w1"], p["ca_w2"])
    return r + x


def _downsample(x, w):
    # nn.Upsample(scale_factor=0.5, mode='trilinear', align_corners=False) on
    # even-sized dims is exactly 2x2x2 average pooling.
    n, c, d, h, w_ = x.shape
    y = x.reshape(n, c, d // 2, 2, h // 2, 2, w_ // 2, 2).mean(axis=(3, 5, 7))
    return _conv3d(y, w)   # 1x1x1 conv: C -> C + scale_unetfeats


def encoder_forward(params, x):
    a = params["prelu_a"]
    h = _conv3d(x, params["conv0_w"], params["conv0_b"])
    for p in params["level1"]:
        h = _cab(h, p, a)
    enc1 = h
    h = _downsample(enc1, params["down12_w"])
    for p in params["level2"]:
        h = _cab(h, p, a)
    enc2 = h
    h = _downsample(enc2, params["down23_w"])
    for p in params["level3"]:
        h = _cab(h, p, a)
    enc3 = h
    return [enc1, enc2, enc3]


def _winit(key, o, i, k):
    fan_in = float(i * k * k * k)
    return jax.random.normal(key, (o, i, k, k, k), jnp.float32) * (fan_in ** -0.5)


def _init_cab(key, c, reduction):
    k1, k2, k3, k4 = jax.random.split(key, 4)
    return {
        "w1": _winit(k1, c, c, 3),
        "w2": _winit(k2, c, c, 3),
        "ca_w1": _winit(k3, c // reduction, c, 1),
        "ca_w2": _winit(k4, c, c // reduction, 1),
    }


def init_encoder_params(key, n_feat=96, reduction=4, scale_unetfeats=48,
                        in_channels=1):
    keys = jax.random.split(key, 9)
    c1 = n_feat
    c2 = n_feat + scale_unetfeats
    c3 = n_feat + 2 * scale_unetfeats
    return {
        "conv0_w": _winit(keys[0], n_feat, in_channels, 3),
        "conv0_b": jnp.zeros((n_feat,), jnp.float32),
        "prelu_a": jnp.float32(0.25),   # shared nn.PReLU() parameter
        "level1": [_init_cab(keys[1], c1, reduction),
                   _init_cab(keys[2], c1, reduction)],
        "down12_w": _winit(keys[3], c2, c1, 1),
        "level2": [_init_cab(keys[4], c2, reduction),
                   _init_cab(keys[5], c2, reduction)],
        "down23_w": _winit(keys[6], c3, c2, 1),
        "level3": [_init_cab(keys[7], c3, reduction),
                   _init_cab(keys[8], c3, reduction)],
    }


def generic_perceptual_loss(params, x, y, feature_layers=(0, 1, 2, 3),
                            compute_dtype=jnp.bfloat16):
    # bf16 feature path: engages the bf16 MXU for the convs and halves the
    # HBM bytes the loss kernel streams (accumulation stays f32 in-kernel).
    cp = jax.tree_util.tree_map(lambda p: p.astype(compute_dtype), params)
    fx = encoder_forward(cp, x.astype(compute_dtype))
    fy = encoder_forward(cp, y.astype(compute_dtype))
    pairs = [(fx[i], fy[i]) for i in range(len(fy)) if i in feature_layers]
    if not pairs:
        return jnp.float32(0.0)
    return fused_l1_mean_sum(pairs)


if __name__ == "__main__":
    key = jax.random.PRNGKey(0)
    kp, kx, ky = jax.random.split(key, 3)

    params = init_encoder_params(kp)
    # Small 3-D volumes consistent with the module: batch=2, in_channels=1,
    # D=8, H=16, W=16 (must survive two 2x trilinear downsamples).
    x = jax.random.normal(kx, (2, 1, 8, 16, 16), dtype=jnp.float32)
    y = jax.random.normal(ky, (2, 1, 8, 16, 16), dtype=jnp.float32)

    loss = jax.jit(generic_perceptual_loss)(params, x, y)
    jax.block_until_ready(loss)

    @jax.jit
    def _reference(params, x, y):
        cp = jax.tree_util.tree_map(lambda p: p.astype(jnp.bfloat16), params)
        fx = encoder_forward(cp, x.astype(jnp.bfloat16))
        fy = encoder_forward(cp, y.astype(jnp.bfloat16))
        return sum(jnp.mean(jnp.abs(a.astype(jnp.float32) - b.astype(jnp.float32)))
                   for a, b in zip(fx, fy))

    ref = _reference(params, x, y)
    jax.block_until_ready(ref)
    assert jnp.allclose(loss, ref, rtol=1e-3, atol=1e-5), (loss, ref)

    # Secondary check: exercises the lane-padding and ragged-tail-block paths
    # (not hit by the encoder feature shapes above).
    ka, kb, kc, kd = jax.random.split(jax.random.PRNGKey(1), 4)
    a0 = jax.random.normal(ka, (2100, 128), jnp.float32)
    b0 = jax.random.normal(kb, (2100, 128), jnp.float32)
    a1 = jax.random.normal(kc, (300, 130), jnp.float32)
    b1 = jax.random.normal(kd, (300, 130), jnp.float32)
    got = jax.jit(
        lambda t: fused_l1_mean_sum([(t[0], t[1]), (t[2], t[3])])
    )((a0, b0, a1, b1))
    jax.block_until_ready(got)
    want = jnp.mean(jnp.abs(a0 - b0)) + jnp.mean(jnp.abs(a1 - b1))
    assert jnp.allclose(got, want, rtol=1e-4, atol=1e-6), (got, want)

    print("KERNEL_OK")
</pallas_src>

<mosaic_0001>
module attributes {stable_mosaic.version = 11 : i64} {
  func.func @kernel(%arg0: i32, %arg1: memref<1536x128xbf16, #tpu.memory_space<vmem>>, %arg2: memref<1536x128xbf16, #tpu.memory_space<vmem>>, %arg3: memref<576x128xbf16, #tpu.memory_space<vmem>>, %arg4: memref<576x128xbf16, #tpu.memory_space<vmem>>, %arg5: memref<96x128xbf16, #tpu.memory_space<vmem>>, %arg6: memref<96x128xbf16, #tpu.memory_space<vmem>>, %arg7: memref<1x128xf32, #tpu.memory_space<vmem>>) attributes {dimension_semantics = [#tpu.dimension_semantics<arbitrary>], iteration_bounds = array<i64: 4>, scalar_prefetch = 0 : i64, scratch_operands = 0 : i64, tpu.core_type = #tpu.core_type<tc>, window_params = [{transform_indices = @transform_0, window_bounds = array<i64: 1536, 128>}, {transform_indices = @transform_1, window_bounds = array<i64: 1536, 128>}, {transform_indices = @transform_2, window_bounds = array<i64: 576, 128>}, {transform_indices = @transform_3, window_bounds = array<i64: 576, 128>}, {transform_indices = @transform_4, window_bounds = array<i64: 96, 128>}, {transform_indices = @transform_5, window_bounds = array<i64: 96, 128>}, {pipeline_mode = #tpu.pipeline_mode<synchronous>, transform_indices = @transform_6, window_bounds = array<i64: 1, 128>}]} {
    %c0_i32 = arith.constant 0 : i32
    %0 = arith.cmpi eq, %arg0, %c0_i32 : i32
    %1 = arith.extui %0 : i1 to i32
    %c0_i32_0 = arith.constant 0 : i32
    %2 = arith.cmpi ne, %1, %c0_i32_0 : i32
    scf.if %2 {
      %cst_9 = arith.constant 0.000000e+00 : f32
      %18 = vector.broadcast %cst_9 : f32 to vector<1x128xf32>
      %c0 = arith.constant 0 : index
      %c0_10 = arith.constant 0 : index
      %19 = vector.load %arg7[%c0, %c0_10] : memref<1x128xf32, #tpu.memory_space<vmem>>, vector<1x128xf32>
      tpu.vector_store %arg7[%c0, %c0_10], %18 {strides = array<i32>} : memref<1x128xf32, #tpu.memory_space<vmem>>, vector<1x128xf32>,
    } else {
    }
    %c0_i32_1 = arith.constant 0 : i32
    %3 = arith.cmpi sge, %arg0, %c0_i32_1 : i32
    %c2_i32 = arith.constant 2 : i32
    %4 = arith.cmpi slt, %arg0, %c2_i32 : i32
    %5 = arith.andi %3, %4 : i1
    %6 = arith.extui %5 : i1 to i32
    %cst = arith.constant 2.54313159E-6 : f32
    %c0_i32_2 = arith.constant 0 : i32
    %7 = arith.cmpi ne, %6, %c0_i32_2 : i32
    scf.if %7 {
      %c0 = arith.constant 0 : index
      %c0_9 = arith.constant 0 : index
      %18 = vector.load %arg7[%c0, %c0_9] : memref<1x128xf32, #tpu.memory_space<vmem>>, vector<1x128xf32>
      %c0_10 = arith.constant 0 : index
      %c0_11 = arith.constant 0 : index
      %19 = vector.load %arg1[%c0_10, %c0_11] : memref<1536x128xbf16, #tpu.memory_space<vmem>>, vector<1536x128xbf16>
      %20 = arith.extf %19 : vector<1536x128xbf16> to vector<1536x128xf32>
      %c0_12 = arith.constant 0 : index
      %c0_13 = arith.constant 0 : index
      %21 = vector.load %arg2[%c0_12, %c0_13] : memref<1536x128xbf16, #tpu.memory_space<vmem>>, vector<1536x128xbf16>
      %22 = arith.extf %21 : vector<1536x128xbf16> to vector<1536x128xf32>
      %23 = arith.subf %20, %22 : vector<1536x128xf32>
      %24 = math.absf %23 : vector<1536x128xf32>
      %cst_14 = arith.constant dense<0.000000e+00> : vector<128xf32>
      %25 = vector.multi_reduction <add>, %24, %cst_14 [0] : vector<1536x128xf32> to vector<128xf32>
      %26 = vector.shape_cast %25 : vector<128xf32> to vector<1x128xf32>
      %27 = vector.broadcast %cst : f32 to vector<1x128xf32>
      %28 = arith.mulf %26, %27 : vector<1x128xf32>
      %29 = arith.addf %18, %28 : vector<1x128xf32>
      %c0_15 = arith.constant 0 : index
      %c0_16 = arith.constant 0 : index
      %30 = vector.load %arg7[%c0_15, %c0_16] : memref<1x128xf32, #tpu.memory_space<vmem>>, vector<1x128xf32>
      tpu.vector_store %arg7[%c0_15, %c0_16], %29 {strides = array<i32>} : memref<1x128xf32, #tpu.memory_space<vmem>>, vector<1x128xf32>,
    } else {
    }
    %c2_i32_3 = arith.constant 2 : i32
    %8 = arith.cmpi sge, %arg0, %c2_i32_3 : i32
    %c3_i32 = arith.constant 3 : i32
    %9 = arith.cmpi slt, %arg0, %c3_i32 : i32
    %10 = arith.andi %8, %9 : i1
    %11 = arith.extui %10 : i1 to i32
    %cst_4 = arith.constant 1.35633682E-5 : f32
    %c0_i32_5 = arith.constant 0 : i32
    %12 = arith.cmpi ne, %11, %c0_i32_5 : i32
    scf.if %12 {
      %c0 = arith.constant 0 : index
      %c0_9 = arith.constant 0 : index
      %18 = vector.load %arg7[%c0, %c0_9] : memref<1x128xf32, #tpu.memory_space<vmem>>, vector<1x128xf32>
      %c0_10 = arith.constant 0 : index
      %c0_11 = arith.constant 0 : index
      %19 = vector.load %arg3[%c0_10, %c0_11] : memref<576x128xbf16, #tpu.memory_space<vmem>>, vector<576x128xbf16>
      %20 = arith.extf %19 : vector<576x128xbf16> to vector<576x128xf32>
      %c0_12 = arith.constant 0 : index
      %c0_13 = arith.constant 0 : index
      %21 = vector.load %arg4[%c0_12, %c0_13] : memref<576x128xbf16, #tpu.memory_space<vmem>>, vector<576x128xbf16>
      %22 = arith.extf %21 : vector<576x128xbf16> to vector<576x128xf32>
      %23 = arith.subf %20, %22 : vector<576x128xf32>
      %24 = math.absf %23 : vector<576x128xf32>
      %cst_14 = arith.constant dense<0.000000e+00> : vector<128xf32>
      %25 = vector.multi_reduction <add>, %24, %cst_14 [0] : vector<576x128xf32> to vector<128xf32>
      %26 = vector.shape_cast %25 : vector<128xf32> to vector<1x128xf32>
      %27 = vector.broadcast %cst_4 : f32 to vector<1x128xf32>
      %28 = arith.mulf %26, %27 : vector<1x128xf32>
      %29 = arith.addf %18, %28 : vector<1x128xf32>
      %c0_15 = arith.constant 0 : index
      %c0_16 = arith.constant 0 : index
      %30 = vector.load %arg7[%c0_15, %c0_16] : memref<1x128xf32, #tpu.memory_space<vmem>>, vector<1x128xf32>
      tpu.vector_store %arg7[%c0_15, %c0_16], %29 {strides = array<i32>} : memref<1x128xf32, #tpu.memory_space<vmem>>, vector<1x128xf32>,
    } else {
    }
    %c3_i32_6 = arith.constant 3 : i32
    %13 = arith.cmpi sge, %arg0, %c3_i32_6 : i32
    %c4_i32 = arith.constant 4 : i32
    %14 = arith.cmpi slt, %arg0, %c4_i32 : i32
    %15 = arith.andi %13, %14 : i1
    %16 = arith.extui %15 : i1 to i32
    %cst_7 = arith.constant 8.13802107E-5 : f32
    %c0_i32_8 = arith.constant 0 : i32
    %17 = arith.cmpi ne, %16, %c0_i32_8 : i32
    scf.if %17 {
      %c0 = arith.constant 0 : index
      %c0_9 = arith.constant 0 : index
      %18 = vector.load %arg7[%c0, %c0_9] : memref<1x128xf32, #tpu.memory_space<vmem>>, vector<1x128xf32>
      %c0_10 = arith.constant 0 : index
      %c0_11 = arith.constant 0 : index
      %19 = vector.load %arg5[%c0_10, %c0_11] : memref<96x128xbf16, #tpu.memory_space<vmem>>, vector<96x128xbf16>
      %20 = arith.extf %19 : vector<96x128xbf16> to vector<96x128xf32>
      %c0_12 = arith.constant 0 : index
      %c0_13 = arith.constant 0 : index
      %21 = vector.load %arg6[%c0_12, %c0_13] : memref<96x128xbf16, #tpu.memory_space<vmem>>, vector<96x128xbf16>
      %22 = arith.extf %21 : vector<96x128xbf16> to vector<96x128xf32>
      %23 = arith.subf %20, %22 : vector<96x128xf32>
      %24 = math.absf %23 : vector<96x128xf32>
      %cst_14 = arith.constant dense<0.000000e+00> : vector<128xf32>
      %25 = vector.multi_reduction <add>, %24, %cst_14 [0] : vector<96x128xf32> to vector<128xf32>
      %26 = vector.shape_cast %25 : vector<128xf32> to vector<1x128xf32>
      %27 = vector.broadcast %cst_7 : f32 to vector<1x128xf32>
      %28 = arith.mulf %26, %27 : vector<1x128xf32>
      %29 = arith.addf %18, %28 : vector<1x128xf32>
      %c0_15 = arith.constant 0 : index
      %c0_16 = arith.constant 0 : index
      %30 = vector.load %arg7[%c0_15, %c0_16] : memref<1x128xf32, #tpu.memory_space<vmem>>, vector<1x128xf32>
      tpu.vector_store %arg7[%c0_15, %c0_16], %29 {strides = array<i32>} : memref<1x128xf32, #tpu.memory_space<vmem>>, vector<1x128xf32>,
    } else {
    }
    return
  }
  func.func @transform_0(%arg0: i32) -> (i32, i32) {
    %c0_i32 = arith.constant 0 : i32
    %0 = arith.subi %arg0, %c0_i32 : i32
    %c0_i32_0 = arith.constant 0 : i32
    %c1_i32 = arith.constant 1 : i32
    %1 = arith.maxsi %c0_i32_0, %0 : i32
    %2 = arith.minsi %c1_i32, %1 : i32
    %c0_i32_1 = arith.constant 0 : i32
    %c0_i32_2 = arith.constant 0 : i32
    return %2, %c0_i32_1 : i32, i32
  }
  func.func @transform_1(%arg0: i32) -> (i32, i32) {
    %c0_i32 = arith.constant 0 : i32
    %0 = arith.subi %arg0, %c0_i32 : i32
    %c0_i32_0 = arith.constant 0 : i32
    %c1_i32 = arith.constant 1 : i32
    %1 = arith.maxsi %c0_i32_0, %0 : i32
    %2 = arith.minsi %c1_i32, %1 : i32
    %c0_i32_1 = arith.constant 0 : i32
    %c0_i32_2 = arith.constant 0 : i32
    return %2, %c0_i32_1 : i32, i32
  }
  func.func @transform_2(%arg0: i32) -> (i32, i32) {
    %c2_i32 = arith.constant 2 : i32
    %0 = arith.subi %arg0, %c2_i32 : i32
    %c0_i32 = arith.constant 0 : i32
    %c0_i32_0 = arith.constant 0 : i32
    %1 = arith.maxsi %c0_i32, %0 : i32
    %2 = arith.minsi %c0_i32_0, %1 : i32
    %c0_i32_1 = arith.constant 0 : i32
    %c0_i32_2 = arith.constant 0 : i32
    return %2, %c0_i32_1 : i32, i32
  }
  func.func @transform_3(%arg0: i32) -> (i32, i32) {
    %c2_i32 = arith.constant 2 : i32
    %0 = arith.subi %arg0, %c2_i32 : i32
    %c0_i32 = arith.constant 0 : i32
    %c0_i32_0 = arith.constant 0 : i32
    %1 = arith.maxsi %c0_i32, %0 : i32
    %2 = arith.minsi %c0_i32_0, %1 : i32
    %c0_i32_1 = arith.constant 0 : i32
    %c0_i32_2 = arith.constant 0 : i32
    return %2, %c0_i32_1 : i32, i32
  }
  func.func @transform_4(%arg0: i32) -> (i32, i32) {
    %c3_i32 = arith.constant 3 : i32
    %0 = arith.subi %arg0, %c3_i32 : i32
    %c0_i32 = arith.constant 0 : i32
    %c0_i32_0 = arith.constant 0 : i32
    %1 = arith.maxsi %c0_i32, %0 : i32
    %2 = arith.minsi %c0_i32_0, %1 : i32
    %c0_i32_1 = arith.constant 0 : i32
    %c0_i32_2 = arith.constant 0 : i32
    return %2, %c0_i32_1 : i32, i32
  }
  func.func @transform_5(%arg0: i32) -> (i32, i32) {
    %c3_i32 = arith.constant 3 : i32
    %0 = arith.subi %arg0, %c3_i32 : i32
    %c0_i32 = arith.constant 0 : i32
    %c0_i32_0 = arith.constant 0 : i32
    %1 = arith.maxsi %c0_i32, %0 : i32
    %2 = arith.minsi %c0_i32_0, %1 : i32
    %c0_i32_1 = arith.constant 0 : i32
    %c0_i32_2 = arith.constant 0 : i32
    return %2, %c0_i32_1 : i32, i32
  }
  func.func @transform_6(%arg0: i32) -> (i32, i32) {
    %c0_i32 = arith.constant 0 : i32
    %c0_i32_0 = arith.constant 0 : i32
    %c0_i32_1 = arith.constant 0 : i32
    return %c0_i32, %c0_i32_0 : i32, i32
  }
}

</mosaic_0001>

<bundles_post_ra>
// kernel: generic_perceptual_loss.1
= control target key start
LH: loop header
LB: loop body
LE: loop exit
PB: predicated region body
PF: predicated region fallthrough
CT: control target
= control target key end

     0   :  { %s4169_s21 = smov 0   ;;  %s4667_s0 = inlined_call_operand.vmem [shape: bf16[3072,128], index: 0, kind: input, shape index: {}]   ;;  %s4668_s1 = inlined_call_operand.vmem [shape: bf16[3072,128], index: 1, kind: input, shape index: {}]   ;;  %s4669_s2 = inlined_call_operand.vmem [shape: bf16[576,128], index: 2, kind: input, shape index: {}]   ;;  %s4670_s3 = inlined_call_operand.vmem [shape: bf16[576,128], index: 3, kind: input, shape index: {}]   ;;  %s4671_s4 = inlined_call_operand.vmem [shape: bf16[96,128], index: 4, kind: input, shape index: {}]   ;;  %s4672_s5 = inlined_call_operand.vmem [shape: bf16[96,128], index: 5, kind: input, shape index: {}]   ;;  %s4673_s6 = inlined_call_operand.vmem [shape: f32[1,128], index: 6, kind: output, shape index: {}]  }
   0x1 LB: > { %s4175_s22 = sadd.s32 4294967295, %s4131_s21   ;;  %p2686_p0 = scmp.ge.s32.totalorder %s4131_s21, 1  ;;  %s4131_s21 = sphi %s4169_s21, %s16_s21  }
   0x2   : > { %p375_p1 = scmp.lt.s32.totalorder %s4131_s21, 5 }
   0x4   : > { %p376_p2 = pnand %p2686_p0, %p375_p1 }
   0x5   : > { %p453_p3 = scmp.gt.s32.totalorder (!%p376_p2), %s4175_s22, 0  ;;  %p2687_p4 = scmp.lt.s32.totalorder (!%p376_p2), %s4175_s22, 1 }
   0x6   : > { %379 = sbr.rel (%p376_p2) target bundleno = 654 (0x28e), region = 44  ;;  %p2727_p6 = scmp.ne.s32.totalorder (!%p376_p2), %s4175_s22, 0 }
   0xd   : > { %s454_s23 = scalar_select %p453_p3, %s4175_s22, 0 }
   0xe   : > { %v4133_v0 = vmov (!%p2727_p6), 0.0  }
   0xf   : > { %s4675_s23 = smov (!%p2687_p4, %s454_s23), 1  ;;  %549 = vst [vmem:[%s4673_s6] sm:$0x1] (!%p2727_p6), %v4133_v0 }
  0x10   : > { %s457_s24 = smul.u32 192, %s4675_s23 }
  0x11   : > { %548 = sbr.rel (%p2727_p6) target bundleno = 24 (0x18), region = 48 }
  0x12   : > { %p458_p5 = scmp.lt.s32.totalorder %s457_s24, 383 }
  0x14   : > { %s4677_s24 = smov (!%p458_p5, %s457_s24), 383 }
  0x15   : > { %s2692_s25 = sshll.u32 %s4677_s24, 2 }
  0x16   : > { %s4185_s28 = scalar_lea.vmem %s4667_s0, %s2692_s25  ;;  %s4190_s7 = scalar_lea.vmem %s4668_s1, %s2692_s25 }
  0x18 PF: > { %p550_p7 = scmp.ge.s32.totalorder %s4175_s22, 0  ;;  %p551_p8 = scmp.lt.s32.totalorder %s4175_s22, 2 }
  0x1a   : > { %p552_p9 = pnand %p551_p8, %p550_p7 }
  0x1b   : > { %v2743_v1 = vld [vmem:[%s4185_s28] sm:$0xff] (!%p552_p9)   ;;  %v3846_v2 = vld [vmem:[%s4185_s28 + $0x8] sm:$0xff] (!%p552_p9)   ;;  %v3847_v8 = vld [vmem:[%s4185_s28 + $0x10] sm:$0xff] (!%p552_p9)  }
  0x1c   : > { %555 = sbr.rel (%p552_p9) target bundleno = 434 (0x1b2), region = 52  ;;  %v3127_v3 = vld [vmem:[%s4190_s7] sm:$0xff] (!%p552_p9)   ;;  %v3941_v4 = vld [vmem:[%s4190_s7 + $0x8] sm:$0xff] (!%p552_p9)   ;;  %v2744_v5 = vunpack.c.l.bf16 (!%p552_p9), %v2743_v1  ;;  %v2745_v6 = vunpack.c.h.bf16 (!%p552_p9), %v2743_v1  ;;  %v2748_v7 = vunpack.c.l.bf16 (!%p552_p9), %v3846_v2  ;;  %v3942_v12 = vld [vmem:[%s4190_s7 + $0x10] sm:$0xff] (!%p552_p9)   ;;  %v2749_v13 = vunpack.c.h.bf16 (!%p552_p9), %v3846_v2 }
  0x1d   : > { %v3128_v9 = vunpack.c.l.bf16 (!%p552_p9), %v3127_v3  ;;  %v3129_v10 = vunpack.c.h.bf16 (!%p552_p9), %v3127_v3  ;;  %v3132_v11 = vunpack.c.l.bf16 (!%p552_p9), %v3941_v4  ;;  %v3133_v14 = vunpack.c.h.bf16 (!%p552_p9), %v3941_v4  ;;  %v3848_v16 = vld [vmem:[%s4185_s28 + $0x18] sm:$0xff] (!%p552_p9)   ;;  %v3849_v26 = vld [vmem:[%s4185_s28 + $0x20] sm:$0xff] (!%p552_p9)   ;;  %v3850_v39 = vld [vmem:[%s4185_s28 + $0x28] sm:$0xff] (!%p552_p9)  }
  0x1e   : > { %v2752_v15 = vunpack.c.l.bf16 (!%p552_p9), %v3847_v8  ;;  %v3136_v17 = vunpack.c.l.bf16 (!%p552_p9), %v3942_v12  ;;  %v3943_v18 = vld [vmem:[%s4190_s7 + $0x18] sm:$0xff] (!%p552_p9)   ;;  %v2753_v22 = vunpack.c.h.bf16 (!%p552_p9), %v3847_v8  ;;  %v3137_v23 = vunpack.c.h.bf16 (!%p552_p9), %v3942_v12  ;;  %v3944_v33 = vld [vmem:[%s4190_s7 + $0x20] sm:$0xff] (!%p552_p9)   ;;  %v3945_v45 = vld [vmem:[%s4190_s7 + $0x28] sm:$0xff] (!%p552_p9)  }
  0x1f   : > { %v1325_v19 = vsub.f32 (!%p552_p9), %v2744_v5, %v3128_v9  ;;  %v1326_v20 = vsub.f32 (!%p552_p9), %v2745_v6, %v3129_v10  ;;  %v1327_v21 = vsub.f32 (!%p552_p9), %v2748_v7, %v3132_v11  ;;  %v1328_v24 = vsub.f32 (!%p552_p9), %v2749_v13, %v3133_v14  ;;  %v3851_v51 = vld [vmem:[%s4185_s28 + $0x30] sm:$0xff] (!%p552_p9)   ;;  %v3852_v63 = vld [vmem:[%s4185_s28 + $0x38] sm:$0xff] (!%p552_p9)   ;;  %v3853_v11 = vld [vmem:[%s4185_s28 + $0x40] sm:$0xff] (!%p552_p9)  }
  0x20   : > { %v2756_v25 = vunpack.c.l.bf16 (!%p552_p9), %v3848_v16  ;;  %v3140_v27 = vunpack.c.l.bf16 (!%p552_p9), %v3943_v18  ;;  %v1329_v28 = vsub.f32 (!%p552_p9), %v2752_v15, %v3136_v17  ;;  %v2757_v32 = vunpack.c.h.bf16 (!%p552_p9), %v3848_v16  ;;  %v3946_v57 = vld [vmem:[%s4190_s7 + $0x30] sm:$0xff] (!%p552_p9)   ;;  %v3947_v5 = vld [vmem:[%s4190_s7 + $0x38] sm:$0xff] (!%p552_p9)   ;;  %v3948_v17 = vld [vmem:[%s4190_s7 + $0x40] sm:$0xff] (!%p552_p9)  }
  0x21   : > { %v1517_v29 = vand.u32 (!%p552_p9), 2147483647, %v1325_v19  ;;  %v1518_v30 = vand.u32 (!%p552_p9), 2147483647, %v1326_v20  ;;  %v1519_v31 = vand.u32 (!%p552_p9), 2147483647, %v1327_v21  ;;  %v3141_v34 = vunpack.c.h.bf16 (!%p552_p9), %v3943_v18 }
  0x22   : > { %v1330_v35 = vsub.f32 (!%p552_p9), %v2753_v22, %v3137_v23  ;;  %v1520_v36 = vand.u32 (!%p552_p9), 2147483647, %v1328_v24  ;;  %v2760_v38 = vunpack.c.l.bf16 (!%p552_p9), %v3849_v26  ;;  %v3144_v40 = vunpack.c.l.bf16 (!%p552_p9), %v3944_v33  ;;  %v3854_v23 = vld [vmem:[%s4185_s28 + $0x48] sm:$0xff] (!%p552_p9)  }
  0x23   : > { %v1709_v37 = vadd.f32 %v1518_v30, %v1517_v29  ;;  %v1331_v41 = vsub.f32 %v2756_v25, %v3140_v27  ;;  %v1521_v42 = vand.u32 2147483647, %v1329_v28  ;;  %v2761_v44 = vunpack.c.h.bf16 %v3849_v26  ;;  %v3949_v29 = vld [vmem:[%s4190_s7 + $0x48] sm:$0xff]  }
  0x24   : > { %v3145_v46 = vunpack.c.h.bf16 %v3944_v33  ;;  %v1332_v47 = vsub.f32 %v2757_v32, %v3141_v34  ;;  %v1522_v48 = vand.u32 2147483647, %v1330_v35  ;;  %v2764_v50 = vunpack.c.l.bf16 %v3850_v39  ;;  %v3855_v35 = vld [vmem:[%s4185_s28 + $0x50] sm:$0xff]  }
  0x25   : > { %v1710_v43 = vadd.f32 %v1709_v37, %v1519_v31  ;;  %v3148_v52 = vunpack.c.l.bf16 %v3945_v45  ;;  %v1333_v53 = vsub.f32 %v2760_v38, %v3144_v40  ;;  %v1523_v54 = vand.u32 2147483647, %v1331_v41  ;;  %v3950_v41 = vld [vmem:[%s4190_s7 + $0x50] sm:$0xff]  }
  0x26   : > { %v2765_v56 = vunpack.c.h.bf16 %v3850_v39  ;;  %v3149_v58 = vunpack.c.h.bf16 %v3945_v45  ;;  %v1334_v59 = vsub.f32 %v2761_v44, %v3145_v46  ;;  %v1524_v60 = vand.u32 2147483647, %v1332_v47  ;;  %v3856_v47 = vld [vmem:[%s4185_s28 + $0x58] sm:$0xff]  }
  0x27   : > { %v1711_v49 = vadd.f32 %v1710_v43, %v1520_v36  ;;  %v2768_v62 = vunpack.c.l.bf16 %v3851_v51  ;;  %v3152_v0 = vunpack.c.l.bf16 %v3946_v57  ;;  %v1335_v1 = vsub.f32 %v2764_v50, %v3148_v52 }
  0x28   : > { %v1525_v2 = vand.u32 2147483647, %v1333_v53  ;;  %v2769_v4 = vunpack.c.h.bf16 %v3851_v51  ;;  %v3153_v6 = vunpack.c.h.bf16 %v3946_v57  ;;  %v1336_v7 = vsub.f32 %v2765_v56, %v3149_v58  ;;  %v3951_v53 = vld [vmem:[%s4190_s7 + $0x58] sm:$0xff]  }
  0x29   : > { %v1712_v55 = vadd.f32 %v1711_v49, %v1521_v42  ;;  %v1526_v8 = vand.u32 2147483647, %v1334_v59  ;;  %v2772_v10 = vunpack.c.l.bf16 %v3852_v63  ;;  %v3156_v12 = vunpack.c.l.bf16 %v3947_v5  ;;  %v3857_v59 = vld [vmem:[%s4185_s28 + $0x60] sm:$0xff]  }
  0x2a   : > { %v1337_v13 = vsub.f32 %v2768_v62, %v3152_v0  ;;  %v1527_v14 = vand.u32 2147483647, %v1335_v1  ;;  %v2773_v16 = vunpack.c.h.bf16 %v3852_v63  ;;  %v3157_v18 = vunpack.c.h.bf16 %v3947_v5  ;;  %v3952_v1 = vld [vmem:[%s4190_s7 + $0x60] sm:$0xff]  }
  0x2b   : > { %v1713_v61 = vadd.f32 %v1712_v55, %v1522_v48  ;;  %v1338_v19 = vsub.f32 %v2769_v4, %v3153_v6  ;;  %v1528_v20 = vand.u32 2147483647, %v1336_v7  ;;  %v2776_v22 = vunpack.c.l.bf16 %v3853_v11  ;;  %v3858_v7 = vld [vmem:[%s4185_s28 + $0x68] sm:$0xff]  }
  0x2c   : > { %v3160_v24 = vunpack.c.l.bf16 %v3948_v17  ;;  %v1339_v25 = vsub.f32 %v2772_v10, %v3156_v12  ;;  %v1529_v26 = vand.u32 2147483647, %v1337_v13  ;;  %v2777_v28 = vunpack.c.h.bf16 %v3853_v11  ;;  %v3953_v13 = vld [vmem:[%s4190_s7 + $0x68] sm:$0xff]  }
  0x2d   : > { %v1714_v3 = vadd.f32 %v1713_v61, %v1523_v54  ;;  %v3161_v30 = vunpack.c.h.bf16 %v3948_v17  ;;  %v1340_v31 = vsub.f32 %v2773_v16, %v3157_v18  ;;  %v1530_v32 = vand.u32 2147483647, %v1338_v19  ;;  %v3859_v19 = vld [vmem:[%s4185_s28 + $0x70] sm:$0xff]  }
  0x2e   : > { %v2780_v34 = vunpack.c.l.bf16 %v3854_v23  ;;  %v3164_v36 = vunpack.c.l.bf16 %v3949_v29  ;;  %v1341_v37 = vsub.f32 %v2776_v22, %v3160_v24  ;;  %v1531_v38 = vand.u32 2147483647, %v1339_v25  ;;  %v3954_v25 = vld [vmem:[%s4190_s7 + $0x70] sm:$0xff]  }
  0x2f   : > { %v1715_v9 = vadd.f32 %v1714_v3, %v1524_v60  ;;  %v2781_v40 = vunpack.c.h.bf16 %v3854_v23  ;;  %v3165_v42 = vunpack.c.h.bf16 %v3949_v29  ;;  %v1342_v43 = vsub.f32 %v2777_v28, %v3161_v30 }
  0x30   : > { %v1532_v44 = vand.u32 2147483647, %v1340_v31  ;;  %v2784_v46 = vunpack.c.l.bf16 %v3855_v35  ;;  %v3168_v48 = vunpack.c.l.bf16 %v3950_v41  ;;  %v1343_v49 = vsub.f32 %v2780_v34, %v3164_v36  ;;  %v3860_v31 = vld [vmem:[%s4185_s28 + $0x78] sm:$0xff]  }
  0x31   : > { %v1716_v15 = vadd.f32 %v1715_v9, %v1525_v2  ;;  %v1533_v50 = vand.u32 2147483647, %v1341_v37  ;;  %v2785_v52 = vunpack.c.h.bf16 %v3855_v35  ;;  %v3169_v54 = vunpack.c.h.bf16 %v3950_v41  ;;  %v3955_v37 = vld [vmem:[%s4190_s7 + $0x78] sm:$0xff]  }
  0x32   : > { %v1344_v55 = vsub.f32 %v2781_v40, %v3165_v42  ;;  %v1534_v56 = vand.u32 2147483647, %v1342_v43  ;;  %v2788_v58 = vunpack.c.l.bf16 %v3856_v47  ;;  %v3172_v60 = vunpack.c.l.bf16 %v3951_v53  ;;  %v3861_v43 = vld [vmem:[%s4185_s28 + $0x80] sm:$0xff]  }
  0x33   : > { %v1717_v21 = vadd.f32 %v1716_v15, %v1526_v8  ;;  %v1345_v61 = vsub.f32 %v2784_v46, %v3168_v48  ;;  %v1535_v62 = vand.u32 2147483647, %v1343_v49  ;;  %v2789_v0 = vunpack.c.h.bf16 %v3856_v47  ;;  %v3956_v49 = vld [vmem:[%s4190_s7 + $0x80] sm:$0xff]  }
  0x34   : > { %v3173_v2 = vunpack.c.h.bf16 %v3951_v53  ;;  %v1346_v3 = vsub.f32 %v2785_v52, %v3169_v54  ;;  %v1536_v4 = vand.u32 2147483647, %v1344_v55  ;;  %v2792_v6 = vunpack.c.l.bf16 %v3857_v59  ;;  %v3862_v55 = vld [vmem:[%s4185_s28 + $0x88] sm:$0xff]  }
  0x35   : > { %v1718_v27 = vadd.f32 %v1717_v21, %v1527_v14  ;;  %v3176_v8 = vunpack.c.l.bf16 %v3952_v1  ;;  %v1347_v9 = vsub.f32 %v2788_v58, %v3172_v60  ;;  %v1537_v10 = vand.u32 2147483647, %v1345_v61  ;;  %v3957_v61 = vld [vmem:[%s4190_s7 + $0x88] sm:$0xff]  }
  0x36   : > { %v2793_v12 = vunpack.c.h.bf16 %v3857_v59  ;;  %v3177_v14 = vunpack.c.h.bf16 %v3952_v1  ;;  %v1348_v15 = vsub.f32 %v2789_v0, %v3173_v2  ;;  %v1538_v16 = vand.u32 2147483647, %v1346_v3  ;;  %v3863_v3 = vld [vmem:[%s4185_s28 + $0x90] sm:$0xff]  }
  0x37   : > { %v1719_v33 = vadd.f32 %v1718_v27, %v1528_v20  ;;  %v2796_v18 = vunpack.c.l.bf16 %v3858_v7  ;;  %v3180_v20 = vunpack.c.l.bf16 %v3953_v13  ;;  %v1349_v21 = vsub.f32 %v2792_v6, %v3176_v8 }
  0x38   : > { %v1539_v22 = vand.u32 2147483647, %v1347_v9  ;;  %v2797_v24 = vunpack.c.h.bf16 %v3858_v7  ;;  %v1350_v27 = vsub.f32 %v2793_v12, %v3177_v14  ;;  %v1540_v28 = vand.u32 2147483647, %v1348_v15  ;;  %v3958_v9 = vld [vmem:[%s4190_s7 + $0x90] sm:$0xff]   ;;  %v3864_v15 = vld [vmem:[%s4185_s28 + $0x98] sm:$0xff]  }
  0x39   : > { %v1720_v39 = vadd.f32 %v1719_v33, %v1529_v26  ;;  %v3181_v26 = vunpack.c.h.bf16 %v3953_v13  ;;  %v2800_v30 = vunpack.c.l.bf16 %v3859_v19  ;;  %v1351_v33 = vsub.f32 %v2796_v18, %v3180_v20 }
  0x3a   : > { %v1541_v34 = vand.u32 2147483647, %v1349_v21  ;;  %v2801_v36 = vunpack.c.h.bf16 %v3859_v19  ;;  %v1542_v40 = vand.u32 2147483647, %v1350_v27  ;;  %v2804_v42 = vunpack.c.l.bf16 %v3860_v31  ;;  %v3959_v21 = vld [vmem:[%s4190_s7 + $0x98] sm:$0xff]   ;;  %v3865_v27 = vld [vmem:[%s4185_s28 + $0xa0] sm:$0xff]  }
  0x3b   : > { %v1721_v45 = vadd.f32 %v1720_v39, %v1530_v32  ;;  %v3184_v32 = vunpack.c.l.bf16 %v3954_v25  ;;  %v1352_v39 = vsub.f32 %v2797_v24, %v3181_v26  ;;  %v1543_v46 = vand.u32 2147483647, %v1351_v33  ;;  %v3960_v33 = vld [vmem:[%s4190_s7 + $0xa0] sm:$0xff]  }
  0x3c   : > { %v2805_v48 = vunpack.c.h.bf16 %v3860_v31  ;;  %v2808_v54 = vunpack.c.l.bf16 %v3861_v43  ;;  %v2809_v60 = vunpack.c.h.bf16 %v3861_v43  ;;  %v2812_v2 = vunpack.c.l.bf16 %v3862_v55 }
  0x3d   : > { %v1722_v51 = vadd.f32 %v1721_v45, %v1531_v38  ;;  %v3185_v38 = vunpack.c.h.bf16 %v3954_v25  ;;  %v1353_v45 = vsub.f32 %v2800_v30, %v3184_v32  ;;  %v1544_v52 = vand.u32 2147483647, %v1352_v39  ;;  %v3866_v39 = vld [vmem:[%s4185_s28 + $0xa8] sm:$0xff]  }
  0x3e   : > { %v2813_v8 = vunpack.c.h.bf16 %v3862_v55  ;;  %v2816_v14 = vunpack.c.l.bf16 %v3863_v3  ;;  %v2817_v20 = vunpack.c.h.bf16 %v3863_v3  ;;  %v2820_v26 = vunpack.c.l.bf16 %v3864_v15 }
  0x3f   : > { %v1723_v57 = vadd.f32 %v1722_v51, %v1532_v44  ;;  %v3188_v44 = vunpack.c.l.bf16 %v3955_v37  ;;  %v1354_v51 = vsub.f32 %v2801_v36, %v3185_v38  ;;  %v1545_v58 = vand.u32 2147483647, %v1353_v45  ;;  %v3961_v45 = vld [vmem:[%s4190_s7 + $0xa8] sm:$0xff]  }
  0x40   : > { %v2821_v32 = vunpack.c.h.bf16 %v3864_v15  ;;  %v2824_v38 = vunpack.c.l.bf16 %v3865_v27 }
  0x41   : > { %v1724_v63 = vadd.f32 %v1723_v57, %v1533_v50  ;;  %v3189_v50 = vunpack.c.h.bf16 %v3955_v37  ;;  %v1355_v57 = vsub.f32 %v2804_v42, %v3188_v44  ;;  %v1546_v0 = vand.u32 2147483647, %v1354_v51  ;;  %v3867_v51 = vld [vmem:[%s4185_s28 + $0xb0] sm:$0xff]  }
  0x42   : > { %v2825_v44 = vunpack.c.h.bf16 %v3865_v27 }
  0x43   : > { %v1725_v5 = vadd.f32 %v1724_v63, %v1534_v56  ;;  %v3192_v56 = vunpack.c.l.bf16 %v3956_v49  ;;  %v1356_v63 = vsub.f32 %v2805_v48, %v3189_v50  ;;  %v1547_v6 = vand.u32 2147483647, %v1355_v57  ;;  %v3962_v57 = vld [vmem:[%s4190_s7 + $0xb0] sm:$0xff]  }
  0x44   : > { %v2828_v50 = vunpack.c.l.bf16 %v3866_v39 }
  0x45   : > { %v1726_v11 = vadd.f32 %v1725_v5, %v1535_v62  ;;  %v3193_v62 = vunpack.c.h.bf16 %v3956_v49  ;;  %v1357_v5 = vsub.f32 %v2808_v54, %v3192_v56  ;;  %v1548_v12 = vand.u32 2147483647, %v1356_v63  ;;  %v3868_v63 = vld [vmem:[%s4185_s28 + $0xb8] sm:$0xff]  }
  0x46   : > { %v2829_v56 = vunpack.c.h.bf16 %v3866_v39 }
  0x47   : > { %v1727_v17 = vadd.f32 %v1726_v11, %v1536_v4  ;;  %v3196_v4 = vunpack.c.l.bf16 %v3957_v61  ;;  %v1358_v11 = vsub.f32 %v2809_v60, %v3193_v62  ;;  %v1549_v18 = vand.u32 2147483647, %v1357_v5  ;;  %v3963_v5 = vld [vmem:[%s4190_s7 + $0xb8] sm:$0xff]  }
  0x48   : > { %v2832_v62 = vunpack.c.l.bf16 %v3867_v51 }
  0x49   : > { %v1728_v23 = vadd.f32 %v1727_v17, %v1537_v10  ;;  %v3197_v10 = vunpack.c.h.bf16 %v3957_v61  ;;  %v1359_v17 = vsub.f32 %v2812_v2, %v3196_v4  ;;  %v1550_v24 = vand.u32 2147483647, %v1358_v11  ;;  %v3869_v11 = vld [vmem:[%s4185_s28 + $0xc0] sm:$0xff]  }
  0x4a   : > { %v2833_v4 = vunpack.c.h.bf16 %v3867_v51 }
  0x4b   : > { %v1729_v29 = vadd.f32 %v1728_v23, %v1538_v16  ;;  %v3200_v16 = vunpack.c.l.bf16 %v3958_v9  ;;  %v1360_v23 = vsub.f32 %v2813_v8, %v3197_v10  ;;  %v1551_v30 = vand.u32 2147483647, %v1359_v17  ;;  %v3964_v17 = vld [vmem:[%s4190_s7 + $0xc0] sm:$0xff]  }
  0x4c   : > { %v2836_v10 = vunpack.c.l.bf16 %v3868_v63 }
  0x4d   : > { %v1730_v35 = vadd.f32 %v1729_v29, %v1539_v22  ;;  %v3201_v22 = vunpack.c.h.bf16 %v3958_v9  ;;  %v1361_v29 = vsub.f32 %v2816_v14, %v3200_v16  ;;  %v1552_v36 = vand.u32 2147483647, %v1360_v23  ;;  %v3870_v23 = vld [vmem:[%s4185_s28 + $0xc8] sm:$0xff]  }
  0x4e   : > { %v2837_v16 = vunpack.c.h.bf16 %v3868_v63 }
  0x4f   : > { %v1731_v41 = vadd.f32 %v1730_v35, %v1540_v28  ;;  %v3204_v28 = vunpack.c.l.bf16 %v3959_v21  ;;  %v1362_v35 = vsub.f32 %v2817_v20, %v3201_v22  ;;  %v1553_v42 = vand.u32 2147483647, %v1361_v29  ;;  %v3965_v29 = vld [vmem:[%s4190_s7 + $0xc8] sm:$0xff]  }
  0x50   : > { %v2840_v22 = vunpack.c.l.bf16 %v3869_v11 }
  0x51   : > { %v1732_v47 = vadd.f32 %v1731_v41, %v1541_v34  ;;  %v3205_v34 = vunpack.c.h.bf16 %v3959_v21  ;;  %v1363_v41 = vsub.f32 %v2820_v26, %v3204_v28  ;;  %v1554_v48 = vand.u32 2147483647, %v1362_v35  ;;  %v3871_v35 = vld [vmem:[%s4185_s28 + $0xd0] sm:$0xff]  }
  0x52   : > { %v2841_v28 = vunpack.c.h.bf16 %v3869_v11 }
  0x53   : > { %v1733_v53 = vadd.f32 %v1732_v47, %v1542_v40  ;;  %v3208_v40 = vunpack.c.l.bf16 %v3960_v33  ;;  %v1364_v47 = vsub.f32 %v2821_v32, %v3205_v34  ;;  %v1555_v54 = vand.u32 2147483647, %v1363_v41  ;;  %v3966_v41 = vld [vmem:[%s4190_s7 + $0xd0] sm:$0xff]  }
  0x54   : > { %v2844_v34 = vunpack.c.l.bf16 %v3870_v23 }
  0x55   : > { %v1734_v59 = vadd.f32 %v1733_v53, %v1543_v46  ;;  %v3209_v46 = vunpack.c.h.bf16 %v3960_v33  ;;  %v1365_v53 = vsub.f32 %v2824_v38, %v3208_v40  ;;  %v1556_v60 = vand.u32 2147483647, %v1364_v47  ;;  %v3872_v47 = vld [vmem:[%s4185_s28 + $0xd8] sm:$0xff]  }
  0x56   : > { %v2845_v40 = vunpack.c.h.bf16 %v3870_v23 }
  0x57   : > { %v1735_v1 = vadd.f32 %v1734_v59, %v1544_v52  ;;  %v3212_v52 = vunpack.c.l.bf16 %v3961_v45  ;;  %v1366_v59 = vsub.f32 %v2825_v44, %v3209_v46  ;;  %v1557_v2 = vand.u32 2147483647, %v1365_v53  ;;  %v3967_v53 = vld [vmem:[%s4190_s7 + $0xd8] sm:$0xff]  }
  0x58   : > { %v2848_v46 = vunpack.c.l.bf16 %v3871_v35 }
  0x59   : > { %v1736_v7 = vadd.f32 %v1735_v1, %v1545_v58  ;;  %v3213_v58 = vunpack.c.h.bf16 %v3961_v45  ;;  %v1367_v1 = vsub.f32 %v2828_v50, %v3212_v52  ;;  %v1558_v8 = vand.u32 2147483647, %v1366_v59  ;;  %v3873_v59 = vld [vmem:[%s4185_s28 + $0xe0] sm:$0xff]  }
  0x5a   : > { %v2849_v52 = vunpack.c.h.bf16 %v3871_v35 }
  0x5b   : > { %v1737_v13 = vadd.f32 %v1736_v7, %v1546_v0  ;;  %v3216_v0 = vunpack.c.l.bf16 %v3962_v57  ;;  %v1368_v7 = vsub.f32 %v2829_v56, %v3213_v58  ;;  %v1559_v14 = vand.u32 2147483647, %v1367_v1  ;;  %v3968_v1 = vld [vmem:[%s4190_s7 + $0xe0] sm:$0xff]  }
  0x5c   : > { %v2852_v58 = vunpack.c.l.bf16 %v3872_v47 }
  0x5d   : > { %v1738_v19 = vadd.f32 %v1737_v13, %v1547_v6  ;;  %v3217_v6 = vunpack.c.h.bf16 %v3962_v57  ;;  %v1369_v13 = vsub.f32 %v2832_v62, %v3216_v0  ;;  %v1560_v20 = vand.u32 2147483647, %v1368_v7  ;;  %v3874_v7 = vld [vmem:[%s4185_s28 + $0xe8] sm:$0xff]  }
  0x5e   : > { %v2853_v0 = vunpack.c.h.bf16 %v3872_v47 }
  0x5f   : > { %v1739_v25 = vadd.f32 %v1738_v19, %v1548_v12  ;;  %v3220_v12 = vunpack.c.l.bf16 %v3963_v5  ;;  %v1370_v19 = vsub.f32 %v2833_v4, %v3217_v6  ;;  %v1561_v26 = vand.u32 2147483647, %v1369_v13  ;;  %v3969_v13 = vld [vmem:[%s4190_s7 + $0xe8] sm:$0xff]  }
  0x60   : > { %v2856_v6 = vunpack.c.l.bf16 %v3873_v59 }
  0x61   : > { %v1740_v31 = vadd.f32 %v1739_v25, %v1549_v18  ;;  %v3221_v18 = vunpack.c.h.bf16 %v3963_v5  ;;  %v1371_v25 = vsub.f32 %v2836_v10, %v3220_v12  ;;  %v1562_v32 = vand.u32 2147483647, %v1370_v19  ;;  %v3875_v19 = vld [vmem:[%s4185_s28 + $0xf0] sm:$0xff]  }
  0x62   : > { %v2857_v12 = vunpack.c.h.bf16 %v3873_v59 }
  0x63   : > { %v1741_v37 = vadd.f32 %v1740_v31, %v1550_v24  ;;  %v3224_v24 = vunpack.c.l.bf16 %v3964_v17  ;;  %v1372_v31 = vsub.f32 %v2837_v16, %v3221_v18  ;;  %v1563_v38 = vand.u32 2147483647, %v1371_v25  ;;  %v3970_v25 = vld [vmem:[%s4190_s7 + $0xf0] sm:$0xff]  }
  0x64   : > { %v2860_v18 = vunpack.c.l.bf16 %v3874_v7 }
  0x65   : > { %v1742_v43 = vadd.f32 %v1741_v37, %v1551_v30  ;;  %v3225_v30 = vunpack.c.h.bf16 %v3964_v17  ;;  %v1373_v37 = vsub.f32 %v2840_v22, %v3224_v24  ;;  %v1564_v44 = vand.u32 2147483647, %v1372_v31  ;;  %v3876_v31 = vld [vmem:[%s4185_s28 + $0xf8] sm:$0xff]  }
  0x66   : > { %v2861_v24 = vunpack.c.h.bf16 %v3874_v7 }
  0x67   : > { %v1743_v49 = vadd.f32 %v1742_v43, %v1552_v36  ;;  %v3228_v36 = vunpack.c.l.bf16 %v3965_v29  ;;  %v1374_v43 = vsub.f32 %v2841_v28, %v3225_v30  ;;  %v1565_v50 = vand.u32 2147483647, %v1373_v37  ;;  %v3971_v37 = vld [vmem:[%s4190_s7 + $0xf8] sm:$0xff]  }
  0x68   : > { %v2864_v30 = vunpack.c.l.bf16 %v3875_v19 }
  0x69   : > { %v1744_v55 = vadd.f32 %v1743_v49, %v1553_v42  ;;  %v3229_v42 = vunpack.c.h.bf16 %v3965_v29  ;;  %v1375_v49 = vsub.f32 %v2844_v34, %v3228_v36  ;;  %v1566_v56 = vand.u32 2147483647, %v1374_v43  ;;  %v3877_v43 = vld [vmem:[%s4185_s28 + $0x100] sm:$0xff]  }
  0x6a   : > { %v2865_v36 = vunpack.c.h.bf16 %v3875_v19 }
  0x6b   : > { %v1745_v61 = vadd.f32 %v1744_v55, %v1554_v48  ;;  %v3232_v48 = vunpack.c.l.bf16 %v3966_v41  ;;  %v1376_v55 = vsub.f32 %v2845_v40, %v3229_v42  ;;  %v1567_v62 = vand.u32 2147483647, %v1375_v49  ;;  %v3972_v49 = vld [vmem:[%s4190_s7 + $0x100] sm:$0xff]  }
  0x6c   : > { %v2868_v42 = vunpack.c.l.bf16 %v3876_v31 }
  0x6d   : > { %v1746_v3 = vadd.f32 %v1745_v61, %v1555_v54  ;;  %v3233_v54 = vunpack.c.h.bf16 %v3966_v41  ;;  %v1377_v61 = vsub.f32 %v2848_v46, %v3232_v48  ;;  %v1568_v4 = vand.u32 2147483647, %v1376_v55  ;;  %v3878_v55 = vld [vmem:[%s4185_s28 + $0x108] sm:$0xff]  }
  0x6e   : > { %v2869_v48 = vunpack.c.h.bf16 %v3876_v31 }
  0x6f   : > { %v1747_v9 = vadd.f32 %v1746_v3, %v1556_v60  ;;  %v3236_v60 = vunpack.c.l.bf16 %v3967_v53  ;;  %v1378_v3 = vsub.f32 %v2849_v52, %v3233_v54  ;;  %v1569_v10 = vand.u32 2147483647, %v1377_v61  ;;  %v3973_v61 = vld [vmem:[%s4190_s7 + $0x108] sm:$0xff]  }
  0x70   : > { %v2872_v54 = vunpack.c.l.bf16 %v3877_v43 }
  0x71   : > { %v1748_v15 = vadd.f32 %v1747_v9, %v1557_v2  ;;  %v3237_v2 = vunpack.c.h.bf16 %v3967_v53  ;;  %v1379_v9 = vsub.f32 %v2852_v58, %v3236_v60  ;;  %v1570_v16 = vand.u32 2147483647, %v1378_v3  ;;  %v3879_v3 = vld [vmem:[%s4185_s28 + $0x110] sm:$0xff]  }
  0x72   : > { %v2873_v60 = vunpack.c.h.bf16 %v3877_v43 }
  0x73   : > { %v1749_v21 = vadd.f32 %v1748_v15, %v1558_v8  ;;  %v3240_v8 = vunpack.c.l.bf16 %v3968_v1  ;;  %v1380_v15 = vsub.f32 %v2853_v0, %v3237_v2  ;;  %v1571_v22 = vand.u32 2147483647, %v1379_v9  ;;  %v3974_v9 = vld [vmem:[%s4190_s7 + $0x110] sm:$0xff]  }
  0x74   : > { %v2876_v2 = vunpack.c.l.bf16 %v3878_v55 }
  0x75   : > { %v1750_v27 = vadd.f32 %v1749_v21, %v1559_v14  ;;  %v3241_v14 = vunpack.c.h.bf16 %v3968_v1  ;;  %v1381_v21 = vsub.f32 %v2856_v6, %v3240_v8  ;;  %v1572_v28 = vand.u32 2147483647, %v1380_v15  ;;  %v3880_v15 = vld [vmem:[%s4185_s28 + $0x118] sm:$0xff]  }
  0x76   : > { %v2877_v8 = vunpack.c.h.bf16 %v3878_v55 }
  0x77   : > { %v1751_v33 = vadd.f32 %v1750_v27, %v1560_v20  ;;  %v3244_v20 = vunpack.c.l.bf16 %v3969_v13  ;;  %v1382_v27 = vsub.f32 %v2857_v12, %v3241_v14  ;;  %v1573_v34 = vand.u32 2147483647, %v1381_v21  ;;  %v3975_v21 = vld [vmem:[%s4190_s7 + $0x118] sm:$0xff]  }
  0x78   : > { %v2880_v14 = vunpack.c.l.bf16 %v3879_v3 }
  0x79   : > { %v1752_v39 = vadd.f32 %v1751_v33, %v1561_v26  ;;  %v3245_v26 = vunpack.c.h.bf16 %v3969_v13  ;;  %v1383_v33 = vsub.f32 %v2860_v18, %v3244_v20  ;;  %v1574_v40 = vand.u32 2147483647, %v1382_v27  ;;  %v3881_v27 = vld [vmem:[%s4185_s28 + $0x120] sm:$0xff]  }
  0x7a   : > { %v2881_v20 = vunpack.c.h.bf16 %v3879_v3 }
  0x7b   : > { %v1753_v45 = vadd.f32 %v1752_v39, %v1562_v32  ;;  %v3248_v32 = vunpack.c.l.bf16 %v3970_v25  ;;  %v1384_v39 = vsub.f32 %v2861_v24, %v3245_v26  ;;  %v1575_v46 = vand.u32 2147483647, %v1383_v33  ;;  %v3976_v33 = vld [vmem:[%s4190_s7 + $0x120] sm:$0xff]  }
  0x7c   : > { %v2884_v26 = vunpack.c.l.bf16 %v3880_v15 }
  0x7d   : > { %v1754_v51 = vadd.f32 %v1753_v45, %v1563_v38  ;;  %v3249_v38 = vunpack.c.h.bf16 %v3970_v25  ;;  %v1385_v45 = vsub.f32 %v2864_v30, %v3248_v32  ;;  %v1576_v52 = vand.u32 2147483647, %v1384_v39  ;;  %v3882_v39 = vld [vmem:[%s4185_s28 + $0x128] sm:$0xff]  }
  0x7e   : > { %v2885_v32 = vunpack.c.h.bf16 %v3880_v15 }
  0x7f   : > { %v1755_v57 = vadd.f32 %v1754_v51, %v1564_v44  ;;  %v3252_v44 = vunpack.c.l.bf16 %v3971_v37  ;;  %v1386_v51 = vsub.f32 %v2865_v36, %v3249_v38  ;;  %v1577_v58 = vand.u32 2147483647, %v1385_v45  ;;  %v3977_v45 = vld [vmem:[%s4190_s7 + $0x128] sm:$0xff]  }
  0x80   : > { %v2888_v38 = vunpack.c.l.bf16 %v3881_v27 }
  0x81   : > { %v1756_v63 = vadd.f32 %v1755_v57, %v1565_v50  ;;  %v3253_v50 = vunpack.c.h.bf16 %v3971_v37  ;;  %v1387_v57 = vsub.f32 %v2868_v42, %v3252_v44  ;;  %v1578_v0 = vand.u32 2147483647, %v1386_v51  ;;  %v3883_v51 = vld [vmem:[%s4185_s28 + $0x130] sm:$0xff]  }
  0x82   : > { %v2889_v44 = vunpack.c.h.bf16 %v3881_v27 }
  0x83   : > { %v1757_v5 = vadd.f32 %v1756_v63, %v1566_v56  ;;  %v3256_v56 = vunpack.c.l.bf16 %v3972_v49  ;;  %v1388_v63 = vsub.f32 %v2869_v48, %v3253_v50  ;;  %v1579_v6 = vand.u32 2147483647, %v1387_v57  ;;  %v3978_v57 = vld [vmem:[%s4190_s7 + $0x130] sm:$0xff]  }
  0x84   : > { %v2892_v50 = vunpack.c.l.bf16 %v3882_v39 }
  0x85   : > { %v1758_v11 = vadd.f32 %v1757_v5, %v1567_v62  ;;  %v3257_v62 = vunpack.c.h.bf16 %v3972_v49  ;;  %v1389_v5 = vsub.f32 %v2872_v54, %v3256_v56  ;;  %v1580_v12 = vand.u32 2147483647, %v1388_v63  ;;  %v3884_v63 = vld [vmem:[%s4185_s28 + $0x138] sm:$0xff]  }
  0x86   : > { %v2893_v56 = vunpack.c.h.bf16 %v3882_v39 }
  0x87   : > { %v1759_v17 = vadd.f32 %v1758_v11, %v1568_v4  ;;  %v3260_v4 = vunpack.c.l.bf16 %v3973_v61  ;;  %v1390_v11 = vsub.f32 %v2873_v60, %v3257_v62  ;;  %v1581_v18 = vand.u32 2147483647, %v1389_v5  ;;  %v3979_v5 = vld [vmem:[%s4190_s7 + $0x138] sm:$0xff]  }
  0x88   : > { %v2896_v62 = vunpack.c.l.bf16 %v3883_v51 }
  0x89   : > { %v1760_v23 = vadd.f32 %v1759_v17, %v1569_v10  ;;  %v3261_v10 = vunpack.c.h.bf16 %v3973_v61  ;;  %v1391_v17 = vsub.f32 %v2876_v2, %v3260_v4  ;;  %v1582_v24 = vand.u32 2147483647, %v1390_v11  ;;  %v3885_v11 = vld [vmem:[%s4185_s28 + $0x140] sm:$0xff]  }
  0x8a   : > { %v2897_v4 = vunpack.c.h.bf16 %v3883_v51 }
  0x8b   : > { %v1761_v29 = vadd.f32 %v1760_v23, %v1570_v16  ;;  %v3264_v16 = vunpack.c.l.bf16 %v3974_v9  ;;  %v1392_v23 = vsub.f32 %v2877_v8, %v3261_v10  ;;  %v1583_v30 = vand.u32 2147483647, %v1391_v17  ;;  %v3980_v17 = vld [vmem:[%s4190_s7 + $0x140] sm:$0xff]  }
  0x8c   : > { %v2900_v10 = vunpack.c.l.bf16 %v3884_v63 }
  0x8d   : > { %v1762_v35 = vadd.f32 %v1761_v29, %v1571_v22  ;;  %v3265_v22 = vunpack.c.h.bf16 %v3974_v9  ;;  %v1393_v29 = vsub.f32 %v2880_v14, %v3264_v16  ;;  %v1584_v36 = vand.u32 2147483647, %v1392_v23  ;;  %v3886_v23 = vld [vmem:[%s4185_s28 + $0x148] sm:$0xff]  }
  0x8e   : > { %v2901_v16 = vunpack.c.h.bf16 %v3884_v63 }
  0x8f   : > { %v1763_v41 = vadd.f32 %v1762_v35, %v1572_v28  ;;  %v3268_v28 = vunpack.c.l.bf16 %v3975_v21  ;;  %v1394_v35 = vsub.f32 %v2881_v20, %v3265_v22  ;;  %v1585_v42 = vand.u32 2147483647, %v1393_v29  ;;  %v3981_v29 = vld [vmem:[%s4190_s7 + $0x148] sm:$0xff]  }
  0x90   : > { %v2904_v22 = vunpack.c.l.bf16 %v3885_v11 }
  0x91   : > { %v1764_v47 = vadd.f32 %v1763_v41, %v1573_v34  ;;  %v3269_v34 = vunpack.c.h.bf16 %v3975_v21  ;;  %v1395_v41 = vsub.f32 %v2884_v26, %v3268_v28  ;;  %v1586_v48 = vand.u32 2147483647, %v1394_v35  ;;  %v3887_v35 = vld [vmem:[%s4185_s28 + $0x150] sm:$0xff]  }
  0x92   : > { %v2905_v28 = vunpack.c.h.bf16 %v3885_v11 }
  0x93   : > { %v1765_v53 = vadd.f32 %v1764_v47, %v1574_v40  ;;  %v3272_v40 = vunpack.c.l.bf16 %v3976_v33  ;;  %v1396_v47 = vsub.f32 %v2885_v32, %v3269_v34  ;;  %v1587_v54 = vand.u32 2147483647, %v1395_v41  ;;  %v3982_v41 = vld [vmem:[%s4190_s7 + $0x150] sm:$0xff]  }
  0x94   : > { %v2908_v34 = vunpack.c.l.bf16 %v3886_v23 }
  0x95   : > { %v1766_v59 = vadd.f32 %v1765_v53, %v1575_v46  ;;  %v3273_v46 = vunpack.c.h.bf16 %v3976_v33  ;;  %v1397_v53 = vsub.f32 %v2888_v38, %v3272_v40  ;;  %v1588_v60 = vand.u32 2147483647, %v1396_v47  ;;  %v3888_v47 = vld [vmem:[%s4185_s28 + $0x158] sm:$0xff]  }
  0x96   : > { %v2909_v40 = vunpack.c.h.bf16 %v3886_v23 }
  0x97   : > { %v1767_v1 = vadd.f32 %v1766_v59, %v1576_v52  ;;  %v3276_v52 = vunpack.c.l.bf16 %v3977_v45  ;;  %v1398_v59 = vsub.f32 %v2889_v44, %v3273_v46  ;;  %v1589_v2 = vand.u32 2147483647, %v1397_v53  ;;  %v3983_v53 = vld [vmem:[%s4190_s7 + $0x158] sm:$0xff]  }
  0x98   : > { %v2912_v46 = vunpack.c.l.bf16 %v3887_v35 }
  0x99   : > { %v1768_v7 = vadd.f32 %v1767_v1, %v1577_v58  ;;  %v3277_v58 = vunpack.c.h.bf16 %v3977_v45  ;;  %v1399_v1 = vsub.f32 %v2892_v50, %v3276_v52  ;;  %v1590_v8 = vand.u32 2147483647, %v1398_v59  ;;  %v3889_v59 = vld [vmem:[%s4185_s28 + $0x160] sm:$0xff]  }
  0x9a   : > { %v2913_v52 = vunpack.c.h.bf16 %v3887_v35 }
  0x9b   : > { %v1769_v13 = vadd.f32 %v1768_v7, %v1578_v0  ;;  %v3280_v0 = vunpack.c.l.bf16 %v3978_v57  ;;  %v1400_v7 = vsub.f32 %v2893_v56, %v3277_v58  ;;  %v1591_v14 = vand.u32 2147483647, %v1399_v1  ;;  %v3984_v1 = vld [vmem:[%s4190_s7 + $0x160] sm:$0xff]  }
  0x9c   : > { %v2916_v58 = vunpack.c.l.bf16 %v3888_v47 }
  0x9d   : > { %v1770_v19 = vadd.f32 %v1769_v13, %v1579_v6  ;;  %v3281_v6 = vunpack.c.h.bf16 %v3978_v57  ;;  %v1401_v13 = vsub.f32 %v2896_v62, %v3280_v0  ;;  %v1592_v20 = vand.u32 2147483647, %v1400_v7  ;;  %v3890_v7 = vld [vmem:[%s4185_s28 + $0x168] sm:$0xff]  }
  0x9e   : > { %v2917_v0 = vunpack.c.h.bf16 %v3888_v47 }
  0x9f   : > { %v1771_v25 = vadd.f32 %v1770_v19, %v1580_v12  ;;  %v3284_v12 = vunpack.c.l.bf16 %v3979_v5  ;;  %v1402_v19 = vsub.f32 %v2897_v4, %v3281_v6  ;;  %v1593_v26 = vand.u32 2147483647, %v1401_v13  ;;  %v3985_v13 = vld [vmem:[%s4190_s7 + $0x168] sm:$0xff]  }
  0xa0   : > { %v2920_v6 = vunpack.c.l.bf16 %v3889_v59 }
  0xa1   : > { %v1772_v31 = vadd.f32 %v1771_v25, %v1581_v18  ;;  %v3285_v18 = vunpack.c.h.bf16 %v3979_v5  ;;  %v1403_v25 = vsub.f32 %v2900_v10, %v3284_v12  ;;  %v1594_v32 = vand.u32 2147483647, %v1402_v19  ;;  %v3891_v19 = vld [vmem:[%s4185_s28 + $0x170] sm:$0xff]  }
  0xa2   : > { %v2921_v12 = vunpack.c.h.bf16 %v3889_v59 }
  0xa3   : > { %v1773_v37 = vadd.f32 %v1772_v31, %v1582_v24  ;;  %v3288_v24 = vunpack.c.l.bf16 %v3980_v17  ;;  %v1404_v31 = vsub.f32 %v2901_v16, %v3285_v18  ;;  %v1595_v38 = vand.u32 2147483647, %v1403_v25  ;;  %v3986_v25 = vld [vmem:[%s4190_s7 + $0x170] sm:$0xff]  }
  0xa4   : > { %v2924_v18 = vunpack.c.l.bf16 %v3890_v7 }
  0xa5   : > { %v1774_v43 = vadd.f32 %v1773_v37, %v1583_v30  ;;  %v3289_v30 = vunpack.c.h.bf16 %v3980_v17  ;;  %v1405_v37 = vsub.f32 %v2904_v22, %v3288_v24  ;;  %v1596_v44 = vand.u32 2147483647, %v1404_v31  ;;  %v3892_v31 = vld [vmem:[%s4185_s28 + $0x178] sm:$0xff]  }
  0xa6   : > { %v2925_v24 = vunpack.c.h.bf16 %v3890_v7 }
  0xa7   : > { %v1775_v49 = vadd.f32 %v1774_v43, %v1584_v36  ;;  %v3292_v36 = vunpack.c.l.bf16 %v3981_v29  ;;  %v1406_v43 = vsub.f32 %v2905_v28, %v3289_v30  ;;  %v1597_v50 = vand.u32 2147483647, %v1405_v37  ;;  %v3987_v37 = vld [vmem:[%s4190_s7 + $0x178] sm:$0xff]  }
  0xa8   : > { %v2928_v30 = vunpack.c.l.bf16 %v3891_v19 }
  0xa9   : > { %v1776_v55 = vadd.f32 %v1775_v49, %v1585_v42  ;;  %v3293_v42 = vunpack.c.h.bf16 %v3981_v29  ;;  %v1407_v49 = vsub.f32 %v2908_v34, %v3292_v36  ;;  %v1598_v56 = vand.u32 2147483647, %v1406_v43  ;;  %v3893_v43 = vld [vmem:[%s4185_s28 + $0x180] sm:$0xff]  }
  0xaa   : > { %v2929_v36 = vunpack.c.h.bf16 %v3891_v19 }
  0xab   : > { %v1777_v61 = vadd.f32 %v1776_v55, %v1586_v48  ;;  %v3296_v48 = vunpack.c.l.bf16 %v3982_v41  ;;  %v1408_v55 = vsub.f32 %v2909_v40, %v3293_v42  ;;  %v1599_v62 = vand.u32 2147483647, %v1407_v49  ;;  %v3988_v49 = vld [vmem:[%s4190_s7 + $0x180] sm:$0xff]  }
  0xac   : > { %v2932_v42 = vunpack.c.l.bf16 %v3892_v31 }
  0xad   : > { %v1778_v3 = vadd.f32 %v1777_v61, %v1587_v54  ;;  %v3297_v54 = vunpack.c.h.bf16 %v3982_v41  ;;  %v1409_v61 = vsub.f32 %v2912_v46, %v3296_v48  ;;  %v1600_v4 = vand.u32 2147483647, %v1408_v55  ;;  %v3894_v55 = vld [vmem:[%s4185_s28 + $0x188] sm:$0xff]  }
  0xae   : > { %v2933_v48 = vunpack.c.h.bf16 %v3892_v31 }
  0xaf   : > { %v1779_v9 = vadd.f32 %v1778_v3, %v1588_v60  ;;  %v3300_v60 = vunpack.c.l.bf16 %v3983_v53  ;;  %v1410_v3 = vsub.f32 %v2913_v52, %v3297_v54  ;;  %v1601_v10 = vand.u32 2147483647, %v1409_v61  ;;  %v3989_v61 = vld [vmem:[%s4190_s7 + $0x188] sm:$0xff]  }
  0xb0   : > { %v2936_v54 = vunpack.c.l.bf16 %v3893_v43 }
  0xb1   : > { %v1780_v15 = vadd.f32 %v1779_v9, %v1589_v2  ;;  %v3301_v2 = vunpack.c.h.bf16 %v3983_v53  ;;  %v1411_v9 = vsub.f32 %v2916_v58, %v3300_v60  ;;  %v1602_v16 = vand.u32 2147483647, %v1410_v3  ;;  %v3895_v3 = vld [vmem:[%s4185_s28 + $0x190] sm:$0xff]  }
  0xb2   : > { %v2937_v60 = vunpack.c.h.bf16 %v3893_v43 }
  0xb3   : > { %v1781_v21 = vadd.f32 %v1780_v15, %v1590_v8  ;;  %v3304_v8 = vunpack.c.l.bf16 %v3984_v1  ;;  %v1412_v15 = vsub.f32 %v2917_v0, %v3301_v2  ;;  %v1603_v22 = vand.u32 2147483647, %v1411_v9  ;;  %v3990_v9 = vld [vmem:[%s4190_s7 + $0x190] sm:$0xff]  }
  0xb4   : > { %v2940_v2 = vunpack.c.l.bf16 %v3894_v55 }
  0xb5   : > { %v1782_v27 = vadd.f32 %v1781_v21, %v1591_v14  ;;  %v3305_v14 = vunpack.c.h.bf16 %v3984_v1  ;;  %v1413_v21 = vsub.f32 %v2920_v6, %v3304_v8  ;;  %v1604_v28 = vand.u32 2147483647, %v1412_v15  ;;  %v3896_v15 = vld [vmem:[%s4185_s28 + $0x198] sm:$0xff]  }
  0xb6   : > { %v2941_v8 = vunpack.c.h.bf16 %v3894_v55 }
  0xb7   : > { %v1783_v33 = vadd.f32 %v1782_v27, %v1592_v20  ;;  %v3308_v20 = vunpack.c.l.bf16 %v3985_v13  ;;  %v1414_v27 = vsub.f32 %v2921_v12, %v3305_v14  ;;  %v1605_v34 = vand.u32 2147483647, %v1413_v21  ;;  %v3991_v21 = vld [vmem:[%s4190_s7 + $0x198] sm:$0xff]  }
  0xb8   : > { %v2944_v14 = vunpack.c.l.bf16 %v3895_v3 }
  0xb9   : > { %v1784_v39 = vadd.f32 %v1783_v33, %v1593_v26  ;;  %v3309_v26 = vunpack.c.h.bf16 %v3985_v13  ;;  %v1415_v33 = vsub.f32 %v2924_v18, %v3308_v20  ;;  %v1606_v40 = vand.u32 2147483647, %v1414_v27  ;;  %v3897_v27 = vld [vmem:[%s4185_s28 + $0x1a0] sm:$0xff]  }
  0xba   : > { %v2945_v20 = vunpack.c.h.bf16 %v3895_v3 }
  0xbb   : > { %v1785_v45 = vadd.f32 %v1784_v39, %v1594_v32  ;;  %v3312_v32 = vunpack.c.l.bf16 %v3986_v25  ;;  %v1416_v39 = vsub.f32 %v2925_v24, %v3309_v26  ;;  %v1607_v46 = vand.u32 2147483647, %v1415_v33  ;;  %v3992_v33 = vld [vmem:[%s4190_s7 + $0x1a0] sm:$0xff]  }
  0xbc   : > { %v2948_v26 = vunpack.c.l.bf16 %v3896_v15 }
  0xbd   : > { %v1786_v51 = vadd.f32 %v1785_v45, %v1595_v38  ;;  %v3313_v38 = vunpack.c.h.bf16 %v3986_v25  ;;  %v1417_v45 = vsub.f32 %v2928_v30, %v3312_v32  ;;  %v1608_v52 = vand.u32 2147483647, %v1416_v39  ;;  %v3898_v39 = vld [vmem:[%s4185_s28 + $0x1a8] sm:$0xff]  }
  0xbe   : > { %v2949_v32 = vunpack.c.h.bf16 %v3896_v15 }
  0xbf   : > { %v1787_v57 = vadd.f32 %v1786_v51, %v1596_v44  ;;  %v3316_v44 = vunpack.c.l.bf16 %v3987_v37  ;;  %v1418_v51 = vsub.f32 %v2929_v36, %v3313_v38  ;;  %v1609_v58 = vand.u32 2147483647, %v1417_v45  ;;  %v3993_v45 = vld [vmem:[%s4190_s7 + $0x1a8] sm:$0xff]  }
  0xc0   : > { %v2952_v38 = vunpack.c.l.bf16 %v3897_v27 }
  0xc1   : > { %v1788_v63 = vadd.f32 %v1787_v57, %v1597_v50  ;;  %v3317_v50 = vunpack.c.h.bf16 %v3987_v37  ;;  %v1419_v57 = vsub.f32 %v2932_v42, %v3316_v44  ;;  %v1610_v0 = vand.u32 2147483647, %v1418_v51  ;;  %v3899_v51 = vld [vmem:[%s4185_s28 + $0x1b0] sm:$0xff]  }
  0xc2   : > { %v2953_v44 = vunpack.c.h.bf16 %v3897_v27 }
  0xc3   : > { %v1789_v5 = vadd.f32 %v1788_v63, %v1598_v56  ;;  %v3320_v56 = vunpack.c.l.bf16 %v3988_v49  ;;  %v1420_v63 = vsub.f32 %v2933_v48, %v3317_v50  ;;  %v1611_v6 = vand.u32 2147483647, %v1419_v57  ;;  %v3994_v57 = vld [vmem:[%s4190_s7 + $0x1b0] sm:$0xff]  }
  0xc4   : > { %v2956_v50 = vunpack.c.l.bf16 %v3898_v39 }
  0xc5   : > { %v1790_v11 = vadd.f32 %v1789_v5, %v1599_v62  ;;  %v3321_v62 = vunpack.c.h.bf16 %v3988_v49  ;;  %v1421_v5 = vsub.f32 %v2936_v54, %v3320_v56  ;;  %v1612_v12 = vand.u32 2147483647, %v1420_v63  ;;  %v3900_v63 = vld [vmem:[%s4185_s28 + $0x1b8] sm:$0xff]  }
  0xc6   : > { %v2957_v56 = vunpack.c.h.bf16 %v3898_v39 }
  0xc7   : > { %v1791_v17 = vadd.f32 %v1790_v11, %v1600_v4  ;;  %v3324_v4 = vunpack.c.l.bf16 %v3989_v61  ;;  %v1422_v11 = vsub.f32 %v2937_v60, %v3321_v62  ;;  %v1613_v18 = vand.u32 2147483647, %v1421_v5  ;;  %v3995_v5 = vld [vmem:[%s4190_s7 + $0x1b8] sm:$0xff]  }
  0xc8   : > { %v2960_v62 = vunpack.c.l.bf16 %v3899_v51 }
  0xc9   : > { %v1792_v23 = vadd.f32 %v1791_v17, %v1601_v10  ;;  %v3325_v10 = vunpack.c.h.bf16 %v3989_v61  ;;  %v1423_v17 = vsub.f32 %v2940_v2, %v3324_v4  ;;  %v1614_v24 = vand.u32 2147483647, %v1422_v11  ;;  %v3901_v11 = vld [vmem:[%s4185_s28 + $0x1c0] sm:$0xff]  }
  0xca   : > { %v2961_v4 = vunpack.c.h.bf16 %v3899_v51 }
  0xcb   : > { %v1793_v29 = vadd.f32 %v1792_v23, %v1602_v16  ;;  %v3328_v16 = vunpack.c.l.bf16 %v3990_v9  ;;  %v1424_v23 = vsub.f32 %v2941_v8, %v3325_v10  ;;  %v1615_v30 = vand.u32 2147483647, %v1423_v17  ;;  %v3996_v17 = vld [vmem:[%s4190_s7 + $0x1c0] sm:$0xff]  }
  0xcc   : > { %v2964_v10 = vunpack.c.l.bf16 %v3900_v63 }
  0xcd   : > { %v1794_v35 = vadd.f32 %v1793_v29, %v1603_v22  ;;  %v3329_v22 = vunpack.c.h.bf16 %v3990_v9  ;;  %v1425_v29 = vsub.f32 %v2944_v14, %v3328_v16  ;;  %v1616_v36 = vand.u32 2147483647, %v1424_v23  ;;  %v3902_v23 = vld [vmem:[%s4185_s28 + $0x1c8] sm:$0xff]  }
  0xce   : > { %v2965_v16 = vunpack.c.h.bf16 %v3900_v63 }
  0xcf   : > { %v1795_v41 = vadd.f32 %v1794_v35, %v1604_v28  ;;  %v3332_v28 = vunpack.c.l.bf16 %v3991_v21  ;;  %v1426_v35 = vsub.f32 %v2945_v20, %v3329_v22  ;;  %v1617_v42 = vand.u32 2147483647, %v1425_v29  ;;  %v3997_v29 = vld [vmem:[%s4190_s7 + $0x1c8] sm:$0xff]  }
  0xd0   : > { %v2968_v22 = vunpack.c.l.bf16 %v3901_v11 }
  0xd1   : > { %v1796_v47 = vadd.f32 %v1795_v41, %v1605_v34  ;;  %v3333_v34 = vunpack.c.h.bf16 %v3991_v21  ;;  %v1427_v41 = vsub.f32 %v2948_v26, %v3332_v28  ;;  %v1618_v48 = vand.u32 2147483647, %v1426_v35  ;;  %v3903_v35 = vld [vmem:[%s4185_s28 + $0x1d0] sm:$0xff]  }
  0xd2   : > { %v2969_v28 = vunpack.c.h.bf16 %v3901_v11 }
  0xd3   : > { %v1797_v53 = vadd.f32 %v1796_v47, %v1606_v40  ;;  %v3336_v40 = vunpack.c.l.bf16 %v3992_v33  ;;  %v1428_v47 = vsub.f32 %v2949_v32, %v3333_v34  ;;  %v1619_v54 = vand.u32 2147483647, %v1427_v41  ;;  %v3998_v41 = vld [vmem:[%s4190_s7 + $0x1d0] sm:$0xff]  }
  0xd4   : > { %v2972_v34 = vunpack.c.l.bf16 %v3902_v23 }
  0xd5   : > { %v1798_v59 = vadd.f32 %v1797_v53, %v1607_v46  ;;  %v3337_v46 = vunpack.c.h.bf16 %v3992_v33  ;;  %v1429_v53 = vsub.f32 %v2952_v38, %v3336_v40  ;;  %v1620_v60 = vand.u32 2147483647, %v1428_v47  ;;  %v3904_v47 = vld [vmem:[%s4185_s28 + $0x1d8] sm:$0xff]  }
  0xd6   : > { %v2973_v40 = vunpack.c.h.bf16 %v3902_v23 }
  0xd7   : > { %v1799_v1 = vadd.f32 %v1798_v59, %v1608_v52  ;;  %v3340_v52 = vunpack.c.l.bf16 %v3993_v45  ;;  %v1430_v59 = vsub.f32 %v2953_v44, %v3337_v46  ;;  %v1621_v2 = vand.u32 2147483647, %v1429_v53  ;;  %v3999_v53 = vld [vmem:[%s4190_s7 + $0x1d8] sm:$0xff]  }
  0xd8   : > { %v2976_v46 = vunpack.c.l.bf16 %v3903_v35 }
  0xd9   : > { %v1800_v7 = vadd.f32 %v1799_v1, %v1609_v58  ;;  %v3341_v58 = vunpack.c.h.bf16 %v3993_v45  ;;  %v1431_v1 = vsub.f32 %v2956_v50, %v3340_v52  ;;  %v1622_v8 = vand.u32 2147483647, %v1430_v59  ;;  %v3905_v59 = vld [vmem:[%s4185_s28 + $0x1e0] sm:$0xff]  }
  0xda   : > { %v2977_v52 = vunpack.c.h.bf16 %v3903_v35 }
  0xdb   : > { %v1801_v13 = vadd.f32 %v1800_v7, %v1610_v0  ;;  %v3344_v0 = vunpack.c.l.bf16 %v3994_v57  ;;  %v1432_v7 = vsub.f32 %v2957_v56, %v3341_v58  ;;  %v1623_v14 = vand.u32 2147483647, %v1431_v1  ;;  %v4000_v1 = vld [vmem:[%s4190_s7 + $0x1e0] sm:$0xff]  }
  0xdc   : > { %v2980_v58 = vunpack.c.l.bf16 %v3904_v47 }
  0xdd   : > { %v1802_v19 = vadd.f32 %v1801_v13, %v1611_v6  ;;  %v3345_v6 = vunpack.c.h.bf16 %v3994_v57  ;;  %v1433_v13 = vsub.f32 %v2960_v62, %v3344_v0  ;;  %v1624_v20 = vand.u32 2147483647, %v1432_v7  ;;  %v3906_v7 = vld [vmem:[%s4185_s28 + $0x1e8] sm:$0xff]  }
  0xde   : > { %v2981_v0 = vunpack.c.h.bf16 %v3904_v47 }
  0xdf   : > { %v1803_v25 = vadd.f32 %v1802_v19, %v1612_v12  ;;  %v3348_v12 = vunpack.c.l.bf16 %v3995_v5  ;;  %v1434_v19 = vsub.f32 %v2961_v4, %v3345_v6  ;;  %v1625_v26 = vand.u32 2147483647, %v1433_v13  ;;  %v4001_v13 = vld [vmem:[%s4190_s7 + $0x1e8] sm:$0xff]  }
  0xe0   : > { %v2984_v6 = vunpack.c.l.bf16 %v3905_v59 }
  0xe1   : > { %v1804_v31 = vadd.f32 %v1803_v25, %v1613_v18  ;;  %v3349_v18 = vunpack.c.h.bf16 %v3995_v5  ;;  %v1435_v25 = vsub.f32 %v2964_v10, %v3348_v12  ;;  %v1626_v32 = vand.u32 2147483647, %v1434_v19  ;;  %v3907_v19 = vld [vmem:[%s4185_s28 + $0x1f0] sm:$0xff]  }
  0xe2   : > { %v2985_v12 = vunpack.c.h.bf16 %v3905_v59 }
  0xe3   : > { %v1805_v37 = vadd.f32 %v1804_v31, %v1614_v24  ;;  %v3352_v24 = vunpack.c.l.bf16 %v3996_v17  ;;  %v1436_v31 = vsub.f32 %v2965_v16, %v3349_v18  ;;  %v1627_v38 = vand.u32 2147483647, %v1435_v25  ;;  %v4002_v25 = vld [vmem:[%s4190_s7 + $0x1f0] sm:$0xff]  }
  0xe4   : > { %v2988_v18 = vunpack.c.l.bf16 %v3906_v7 }
  0xe5   : > { %v1806_v43 = vadd.f32 %v1805_v37, %v1615_v30  ;;  %v3353_v30 = vunpack.c.h.bf16 %v3996_v17  ;;  %v1437_v37 = vsub.f32 %v2968_v22, %v3352_v24  ;;  %v1628_v44 = vand.u32 2147483647, %v1436_v31  ;;  %v3908_v31 = vld [vmem:[%s4185_s28 + $0x1f8] sm:$0xff]  }
  0xe6   : > { %v2989_v24 = vunpack.c.h.bf16 %v3906_v7 }
  0xe7   : > { %v1807_v49 = vadd.f32 %v1806_v43, %v1616_v36  ;;  %v3356_v36 = vunpack.c.l.bf16 %v3997_v29  ;;  %v1438_v43 = vsub.f32 %v2969_v28, %v3353_v30  ;;  %v1629_v50 = vand.u32 2147483647, %v1437_v37  ;;  %v4003_v37 = vld [vmem:[%s4190_s7 + $0x1f8] sm:$0xff]  }
  0xe8   : > { %v2992_v30 = vunpack.c.l.bf16 %v3907_v19 }
  0xe9   : > { %v1808_v55 = vadd.f32 %v1807_v49, %v1617_v42  ;;  %v3357_v42 = vunpack.c.h.bf16 %v3997_v29  ;;  %v1439_v49 = vsub.f32 %v2972_v34, %v3356_v36  ;;  %v1630_v56 = vand.u32 2147483647, %v1438_v43  ;;  %v3909_v43 = vld [vmem:[%s4185_s28 + $0x200] sm:$0xff]  }
  0xea   : > { %v2993_v36 = vunpack.c.h.bf16 %v3907_v19 }
  0xeb   : > { %v1809_v61 = vadd.f32 %v1808_v55, %v1618_v48  ;;  %v3360_v48 = vunpack.c.l.bf16 %v3998_v41  ;;  %v1440_v55 = vsub.f32 %v2973_v40, %v3357_v42  ;;  %v1631_v62 = vand.u32 2147483647, %v1439_v49  ;;  %v4004_v49 = vld [vmem:[%s4190_s7 + $0x200] sm:$0xff]  }
  0xec   : > { %v2996_v42 = vunpack.c.l.bf16 %v3908_v31 }
  0xed   : > { %v1810_v3 = vadd.f32 %v1809_v61, %v1619_v54  ;;  %v3361_v54 = vunpack.c.h.bf16 %v3998_v41  ;;  %v1441_v61 = vsub.f32 %v2976_v46, %v3360_v48  ;;  %v1632_v4 = vand.u32 2147483647, %v1440_v55  ;;  %v3910_v55 = vld [vmem:[%s4185_s28 + $0x208] sm:$0xff]  }
  0xee   : > { %v2997_v48 = vunpack.c.h.bf16 %v3908_v31 }
  0xef   : > { %v1811_v9 = vadd.f32 %v1810_v3, %v1620_v60  ;;  %v3364_v60 = vunpack.c.l.bf16 %v3999_v53  ;;  %v1442_v3 = vsub.f32 %v2977_v52, %v3361_v54  ;;  %v1633_v10 = vand.u32 2147483647, %v1441_v61  ;;  %v4005_v61 = vld [vmem:[%s4190_s7 + $0x208] sm:$0xff]  }
  0xf0   : > { %v3000_v54 = vunpack.c.l.bf16 %v3909_v43 }
  0xf1   : > { %v1812_v15 = vadd.f32 %v1811_v9, %v1621_v2  ;;  %v3365_v2 = vunpack.c.h.bf16 %v3999_v53  ;;  %v1443_v9 = vsub.f32 %v2980_v58, %v3364_v60  ;;  %v1634_v16 = vand.u32 2147483647, %v1442_v3  ;;  %v3911_v3 = vld [vmem:[%s4185_s28 + $0x210] sm:$0xff]  }
  0xf2   : > { %v3001_v60 = vunpack.c.h.bf16 %v3909_v43 }
  0xf3   : > { %v1813_v21 = vadd.f32 %v1812_v15, %v1622_v8  ;;  %v3368_v8 = vunpack.c.l.bf16 %v4000_v1  ;;  %v1444_v15 = vsub.f32 %v2981_v0, %v3365_v2  ;;  %v1635_v22 = vand.u32 2147483647, %v1443_v9  ;;  %v4006_v9 = vld [vmem:[%s4190_s7 + $0x210] sm:$0xff]  }
  0xf4   : > { %v3004_v2 = vunpack.c.l.bf16 %v3910_v55 }
  0xf5   : > { %v1814_v27 = vadd.f32 %v1813_v21, %v1623_v14  ;;  %v3369_v14 = vunpack.c.h.bf16 %v4000_v1  ;;  %v1445_v21 = vsub.f32 %v2984_v6, %v3368_v8  ;;  %v1636_v28 = vand.u32 2147483647, %v1444_v15  ;;  %v3912_v15 = vld [vmem:[%s4185_s28 + $0x218] sm:$0xff]  }
  0xf6   : > { %v3005_v8 = vunpack.c.h.bf16 %v3910_v55 }
  0xf7   : > { %v1815_v33 = vadd.f32 %v1814_v27, %v1624_v20  ;;  %v3372_v20 = vunpack.c.l.bf16 %v4001_v13  ;;  %v1446_v27 = vsub.f32 %v2985_v12, %v3369_v14  ;;  %v1637_v34 = vand.u32 2147483647, %v1445_v21  ;;  %v4007_v21 = vld [vmem:[%s4190_s7 + $0x218] sm:$0xff]  }
  0xf8   : > { %v3008_v14 = vunpack.c.l.bf16 %v3911_v3 }
  0xf9   : > { %v1816_v39 = vadd.f32 %v1815_v33, %v1625_v26  ;;  %v3373_v26 = vunpack.c.h.bf16 %v4001_v13  ;;  %v1447_v33 = vsub.f32 %v2988_v18, %v3372_v20  ;;  %v1638_v40 = vand.u32 2147483647, %v1446_v27  ;;  %v3913_v27 = vld [vmem:[%s4185_s28 + $0x220] sm:$0xff]  }
  0xfa   : > { %v3009_v20 = vunpack.c.h.bf16 %v3911_v3 }
  0xfb   : > { %v1817_v45 = vadd.f32 %v1816_v39, %v1626_v32  ;;  %v3376_v32 = vunpack.c.l.bf16 %v4002_v25  ;;  %v1448_v39 = vsub.f32 %v2989_v24, %v3373_v26  ;;  %v1639_v46 = vand.u32 2147483647, %v1447_v33  ;;  %v4008_v33 = vld [vmem:[%s4190_s7 + $0x220] sm:$0xff]  }
  0xfc   : > { %v3012_v26 = vunpack.c.l.bf16 %v3912_v15 }
  0xfd   : > { %v1818_v51 = vadd.f32 %v1817_v45, %v1627_v38  ;;  %v3377_v38 = vunpack.c.h.bf16 %v4002_v25  ;;  %v1449_v45 = vsub.f32 %v2992_v30, %v3376_v32  ;;  %v1640_v52 = vand.u32 2147483647, %v1448_v39  ;;  %v3914_v39 = vld [vmem:[%s4185_s28 + $0x228] sm:$0xff]  }
  0xfe   : > { %v3013_v32 = vunpack.c.h.bf16 %v3912_v15 }
  0xff   : > { %v1819_v57 = vadd.f32 %v1818_v51, %v1628_v44  ;;  %v3380_v44 = vunpack.c.l.bf16 %v4003_v37  ;;  %v1450_v51 = vsub.f32 %v2993_v36, %v3377_v38  ;;  %v1641_v58 = vand.u32 2147483647, %v1449_v45  ;;  %v4009_v45 = vld [vmem:[%s4190_s7 + $0x228] sm:$0xff]  }
 0x100   : > { %v3016_v38 = vunpack.c.l.bf16 %v3913_v27 }
 0x101   : > { %v1820_v63 = vadd.f32 %v1819_v57, %v1629_v50  ;;  %v3381_v50 = vunpack.c.h.bf16 %v4003_v37  ;;  %v1451_v57 = vsub.f32 %v2996_v42, %v3380_v44  ;;  %v1642_v0 = vand.u32 2147483647, %v1450_v51  ;;  %v3915_v51 = vld [vmem:[%s4185_s28 + $0x230] sm:$0xff]  }
 0x102   : > { %v3017_v44 = vunpack.c.h.bf16 %v3913_v27 }
 0x103   : > { %v1821_v5 = vadd.f32 %v1820_v63, %v1630_v56  ;;  %v3384_v56 = vunpack.c.l.bf16 %v4004_v49  ;;  %v1452_v63 = vsub.f32 %v2997_v48, %v3381_v50  ;;  %v1643_v6 = vand.u32 2147483647, %v1451_v57  ;;  %v4010_v57 = vld [vmem:[%s4190_s7 + $0x230] sm:$0xff]  }
 0x104   : > { %v3020_v50 = vunpack.c.l.bf16 %v3914_v39 }
 0x105   : > { %v1822_v11 = vadd.f32 %v1821_v5, %v1631_v62  ;;  %v3385_v62 = vunpack.c.h.bf16 %v4004_v49  ;;  %v1453_v5 = vsub.f32 %v3000_v54, %v3384_v56  ;;  %v1644_v12 = vand.u32 2147483647, %v1452_v63  ;;  %v3916_v63 = vld [vmem:[%s4185_s28 + $0x238] sm:$0xff]  }
 0x106   : > { %v3021_v56 = vunpack.c.h.bf16 %v3914_v39 }
 0x107   : > { %v1823_v17 = vadd.f32 %v1822_v11, %v1632_v4  ;;  %v3388_v4 = vunpack.c.l.bf16 %v4005_v61  ;;  %v1454_v11 = vsub.f32 %v3001_v60, %v3385_v62  ;;  %v1645_v18 = vand.u32 2147483647, %v1453_v5  ;;  %v4011_v5 = vld [vmem:[%s4190_s7 + $0x238] sm:$0xff]  }
 0x108   : > { %v3024_v62 = vunpack.c.l.bf16 %v3915_v51 }
 0x109   : > { %v1824_v23 = vadd.f32 %v1823_v17, %v1633_v10  ;;  %v3389_v10 = vunpack.c.h.bf16 %v4005_v61  ;;  %v1455_v17 = vsub.f32 %v3004_v2, %v3388_v4  ;;  %v1646_v24 = vand.u32 2147483647, %v1454_v11  ;;  %v3917_v11 = vld [vmem:[%s4185_s28 + $0x240] sm:$0xff]  }
 0x10a   : > { %v3025_v4 = vunpack.c.h.bf16 %v3915_v51 }
 0x10b   : > { %v1825_v29 = vadd.f32 %v1824_v23, %v1634_v16  ;;  %v3392_v16 = vunpack.c.l.bf16 %v4006_v9  ;;  %v1456_v23 = vsub.f32 %v3005_v8, %v3389_v10  ;;  %v1647_v30 = vand.u32 2147483647, %v1455_v17  ;;  %v4012_v17 = vld [vmem:[%s4190_s7 + $0x240] sm:$0xff]  }
 0x10c   : > { %v3028_v10 = vunpack.c.l.bf16 %v3916_v63 }
 0x10d   : > { %v1826_v35 = vadd.f32 %v1825_v29, %v1635_v22  ;;  %v3393_v22 = vunpack.c.h.bf16 %v4006_v9  ;;  %v1457_v29 = vsub.f32 %v3008_v14, %v3392_v16  ;;  %v1648_v36 = vand.u32 2147483647, %v1456_v23  ;;  %v3918_v23 = vld [vmem:[%s4185_s28 + $0x248] sm:$0xff]  }
 0x10e   : > { %v3029_v16 = vunpack.c.h.bf16 %v3916_v63 }
 0x10f   : > { %v1827_v41 = vadd.f32 %v1826_v35, %v1636_v28  ;;  %v3396_v28 = vunpack.c.l.bf16 %v4007_v21  ;;  %v1458_v35 = vsub.f32 %v3009_v20, %v3393_v22  ;;  %v1649_v42 = vand.u32 2147483647, %v1457_v29  ;;  %v4013_v29 = vld [vmem:[%s4190_s7 + $0x248] sm:$0xff]  }
 0x110   : > { %v3032_v22 = vunpack.c.l.bf16 %v3917_v11 }
 0x111   : > { %v1828_v47 = vadd.f32 %v1827_v41, %v1637_v34  ;;  %v3397_v34 = vunpack.c.h.bf16 %v4007_v21  ;;  %v1459_v41 = vsub.f32 %v3012_v26, %v3396_v28  ;;  %v1650_v48 = vand.u32 2147483647, %v1458_v35  ;;  %v3919_v35 = vld [vmem:[%s4185_s28 + $0x250] sm:$0xff]  }
 0x112   : > { %v3033_v28 = vunpack.c.h.bf16 %v3917_v11 }
 0x113   : > { %v1829_v53 = vadd.f32 %v1828_v47, %v1638_v40  ;;  %v3400_v40 = vunpack.c.l.bf16 %v4008_v33  ;;  %v1460_v47 = vsub.f32 %v3013_v32, %v3397_v34  ;;  %v1651_v54 = vand.u32 2147483647, %v1459_v41  ;;  %v4014_v41 = vld [vmem:[%s4190_s7 + $0x250] sm:$0xff]  }
 0x114   : > { %v3036_v34 = vunpack.c.l.bf16 %v3918_v23 }
 0x115   : > { %v1830_v59 = vadd.f32 %v1829_v53, %v1639_v46  ;;  %v3401_v46 = vunpack.c.h.bf16 %v4008_v33  ;;  %v1461_v53 = vsub.f32 %v3016_v38, %v3400_v40  ;;  %v1652_v60 = vand.u32 2147483647, %v1460_v47  ;;  %v3920_v47 = vld [vmem:[%s4185_s28 + $0x258] sm:$0xff]  }
 0x116   : > { %v3037_v40 = vunpack.c.h.bf16 %v3918_v23 }
 0x117   : > { %v1831_v1 = vadd.f32 %v1830_v59, %v1640_v52  ;;  %v3404_v52 = vunpack.c.l.bf16 %v4009_v45  ;;  %v1462_v59 = vsub.f32 %v3017_v44, %v3401_v46  ;;  %v1653_v2 = vand.u32 2147483647, %v1461_v53  ;;  %v4015_v53 = vld [vmem:[%s4190_s7 + $0x258] sm:$0xff]  }
 0x118   : > { %v3040_v46 = vunpack.c.l.bf16 %v3919_v35 }
 0x119   : > { %v1832_v7 = vadd.f32 %v1831_v1, %v1641_v58  ;;  %v3405_v58 = vunpack.c.h.bf16 %v4009_v45  ;;  %v1463_v1 = vsub.f32 %v3020_v50, %v3404_v52  ;;  %v1654_v8 = vand.u32 2147483647, %v1462_v59  ;;  %v3921_v59 = vld [vmem:[%s4185_s28 + $0x260] sm:$0xff]  }
 0x11a   : > { %v3041_v52 = vunpack.c.h.bf16 %v3919_v35 }
 0x11b   : > { %v1833_v13 = vadd.f32 %v1832_v7, %v1642_v0  ;;  %v3408_v0 = vunpack.c.l.bf16 %v4010_v57  ;;  %v1464_v7 = vsub.f32 %v3021_v56, %v3405_v58  ;;  %v1655_v14 = vand.u32 2147483647, %v1463_v1  ;;  %v4016_v1 = vld [vmem:[%s4190_s7 + $0x260] sm:$0xff]  }
 0x11c   : > { %v3044_v58 = vunpack.c.l.bf16 %v3920_v47 }
 0x11d   : > { %v1834_v19 = vadd.f32 %v1833_v13, %v1643_v6  ;;  %v3409_v6 = vunpack.c.h.bf16 %v4010_v57  ;;  %v1465_v13 = vsub.f32 %v3024_v62, %v3408_v0  ;;  %v1656_v20 = vand.u32 2147483647, %v1464_v7  ;;  %v3922_v7 = vld [vmem:[%s4185_s28 + $0x268] sm:$0xff]  }
 0x11e   : > { %v3045_v0 = vunpack.c.h.bf16 %v3920_v47 }
 0x11f   : > { %v1835_v25 = vadd.f32 %v1834_v19, %v1644_v12  ;;  %v3412_v12 = vunpack.c.l.bf16 %v4011_v5  ;;  %v1466_v19 = vsub.f32 %v3025_v4, %v3409_v6  ;;  %v1657_v26 = vand.u32 2147483647, %v1465_v13  ;;  %v4017_v13 = vld [vmem:[%s4190_s7 + $0x268] sm:$0xff]  }
 0x120   : > { %v3048_v6 = vunpack.c.l.bf16 %v3921_v59 }
 0x121   : > { %v1836_v31 = vadd.f32 %v1835_v25, %v1645_v18  ;;  %v3413_v18 = vunpack.c.h.bf16 %v4011_v5  ;;  %v1467_v25 = vsub.f32 %v3028_v10, %v3412_v12  ;;  %v1658_v32 = vand.u32 2147483647, %v1466_v19  ;;  %v3923_v19 = vld [vmem:[%s4185_s28 + $0x270] sm:$0xff]  }
 0x122   : > { %v3049_v12 = vunpack.c.h.bf16 %v3921_v59 }
 0x123   : > { %v1837_v37 = vadd.f32 %v1836_v31, %v1646_v24  ;;  %v3416_v24 = vunpack.c.l.bf16 %v4012_v17  ;;  %v1468_v31 = vsub.f32 %v3029_v16, %v3413_v18  ;;  %v1659_v38 = vand.u32 2147483647, %v1467_v25  ;;  %v4018_v25 = vld [vmem:[%s4190_s7 + $0x270] sm:$0xff]  }
 0x124   : > { %v3052_v18 = vunpack.c.l.bf16 %v3922_v7 }
 0x125   : > { %v1838_v43 = vadd.f32 %v1837_v37, %v1647_v30  ;;  %v3417_v30 = vunpack.c.h.bf16 %v4012_v17  ;;  %v1469_v37 = vsub.f32 %v3032_v22, %v3416_v24  ;;  %v1660_v44 = vand.u32 2147483647, %v1468_v31  ;;  %v3924_v31 = vld [vmem:[%s4185_s28 + $0x278] sm:$0xff]  }
 0x126   : > { %v3053_v24 = vunpack.c.h.bf16 %v3922_v7 }
 0x127   : > { %v1839_v49 = vadd.f32 %v1838_v43, %v1648_v36  ;;  %v3420_v36 = vunpack.c.l.bf16 %v4013_v29  ;;  %v1470_v43 = vsub.f32 %v3033_v28, %v3417_v30  ;;  %v1661_v50 = vand.u32 2147483647, %v1469_v37  ;;  %v4019_v37 = vld [vmem:[%s4190_s7 + $0x278] sm:$0xff]  }
 0x128   : > { %v3056_v30 = vunpack.c.l.bf16 %v3923_v19 }
 0x129   : > { %v1840_v55 = vadd.f32 %v1839_v49, %v1649_v42  ;;  %v3421_v42 = vunpack.c.h.bf16 %v4013_v29  ;;  %v1471_v49 = vsub.f32 %v3036_v34, %v3420_v36  ;;  %v1662_v56 = vand.u32 2147483647, %v1470_v43  ;;  %v3925_v43 = vld [vmem:[%s4185_s28 + $0x280] sm:$0xff]  }
 0x12a   : > { %v3057_v36 = vunpack.c.h.bf16 %v3923_v19 }
 0x12b   : > { %v1841_v61 = vadd.f32 %v1840_v55, %v1650_v48  ;;  %v3424_v48 = vunpack.c.l.bf16 %v4014_v41  ;;  %v1472_v55 = vsub.f32 %v3037_v40, %v3421_v42  ;;  %v1663_v62 = vand.u32 2147483647, %v1471_v49  ;;  %v4020_v49 = vld [vmem:[%s4190_s7 + $0x280] sm:$0xff]  }
 0x12c   : > { %v3060_v42 = vunpack.c.l.bf16 %v3924_v31 }
 0x12d   : > { %v1842_v3 = vadd.f32 %v1841_v61, %v1651_v54  ;;  %v3425_v54 = vunpack.c.h.bf16 %v4014_v41  ;;  %v1473_v61 = vsub.f32 %v3040_v46, %v3424_v48  ;;  %v1664_v4 = vand.u32 2147483647, %v1472_v55  ;;  %v3926_v55 = vld [vmem:[%s4185_s28 + $0x288] sm:$0xff]  }
 0x12e   : > { %v3061_v48 = vunpack.c.h.bf16 %v3924_v31 }
 0x12f   : > { %v1843_v9 = vadd.f32 %v1842_v3, %v1652_v60  ;;  %v3428_v60 = vunpack.c.l.bf16 %v4015_v53  ;;  %v1474_v3 = vsub.f32 %v3041_v52, %v3425_v54  ;;  %v1665_v10 = vand.u32 2147483647, %v1473_v61  ;;  %v4021_v61 = vld [vmem:[%s4190_s7 + $0x288] sm:$0xff]  }
 0x130   : > { %v3064_v54 = vunpack.c.l.bf16 %v3925_v43 }
 0x131   : > { %v1844_v15 = vadd.f32 %v1843_v9, %v1653_v2  ;;  %v3429_v2 = vunpack.c.h.bf16 %v4015_v53  ;;  %v1475_v9 = vsub.f32 %v3044_v58, %v3428_v60  ;;  %v1666_v16 = vand.u32 2147483647, %v1474_v3  ;;  %v3927_v3 = vld [vmem:[%s4185_s28 + $0x290] sm:$0xff]  }
 0x132   : > { %v3065_v60 = vunpack.c.h.bf16 %v3925_v43 }
 0x133   : > { %v1845_v21 = vadd.f32 %v1844_v15, %v1654_v8  ;;  %v3432_v8 = vunpack.c.l.bf16 %v4016_v1  ;;  %v1476_v15 = vsub.f32 %v3045_v0, %v3429_v2  ;;  %v1667_v22 = vand.u32 2147483647, %v1475_v9  ;;  %v4022_v9 = vld [vmem:[%s4190_s7 + $0x290] sm:$0xff]  }
 0x134   : > { %v3068_v2 = vunpack.c.l.bf16 %v3926_v55 }
 0x135   : > { %v1846_v27 = vadd.f32 %v1845_v21, %v1655_v14  ;;  %v3433_v14 = vunpack.c.h.bf16 %v4016_v1  ;;  %v1477_v21 = vsub.f32 %v3048_v6, %v3432_v8  ;;  %v1668_v28 = vand.u32 2147483647, %v1476_v15  ;;  %v3928_v15 = vld [vmem:[%s4185_s28 + $0x298] sm:$0xff]  }
 0x136   : > { %v3069_v8 = vunpack.c.h.bf16 %v3926_v55 }
 0x137   : > { %v1847_v33 = vadd.f32 %v1846_v27, %v1656_v20  ;;  %v3436_v20 = vunpack.c.l.bf16 %v4017_v13  ;;  %v1478_v27 = vsub.f32 %v3049_v12, %v3433_v14  ;;  %v1669_v34 = vand.u32 2147483647, %v1477_v21  ;;  %v4023_v21 = vld [vmem:[%s4190_s7 + $0x298] sm:$0xff]  }
 0x138   : > { %v3072_v14 = vunpack.c.l.bf16 %v3927_v3 }
 0x139   : > { %v1848_v39 = vadd.f32 %v1847_v33, %v1657_v26  ;;  %v3437_v26 = vunpack.c.h.bf16 %v4017_v13  ;;  %v1479_v33 = vsub.f32 %v3052_v18, %v3436_v20  ;;  %v1670_v40 = vand.u32 2147483647, %v1478_v27  ;;  %v3929_v27 = vld [vmem:[%s4185_s28 + $0x2a0] sm:$0xff]  }
 0x13a   : > { %v3073_v20 = vunpack.c.h.bf16 %v3927_v3 }
 0x13b   : > { %v1849_v45 = vadd.f32 %v1848_v39, %v1658_v32  ;;  %v3440_v32 = vunpack.c.l.bf16 %v4018_v25  ;;  %v1480_v39 = vsub.f32 %v3053_v24, %v3437_v26  ;;  %v1671_v46 = vand.u32 2147483647, %v1479_v33  ;;  %v4024_v33 = vld [vmem:[%s4190_s7 + $0x2a0] sm:$0xff]  }
 0x13c   : > { %v3076_v26 = vunpack.c.l.bf16 %v3928_v15 }
 0x13d   : > { %v1850_v51 = vadd.f32 %v1849_v45, %v1659_v38  ;;  %v3441_v38 = vunpack.c.h.bf16 %v4018_v25  ;;  %v1481_v45 = vsub.f32 %v3056_v30, %v3440_v32  ;;  %v1672_v52 = vand.u32 2147483647, %v1480_v39  ;;  %v3930_v39 = vld [vmem:[%s4185_s28 + $0x2a8] sm:$0xff]  }
 0x13e   : > { %v3077_v32 = vunpack.c.h.bf16 %v3928_v15 }
 0x13f   : > { %v1851_v57 = vadd.f32 %v1850_v51, %v1660_v44  ;;  %v3444_v44 = vunpack.c.l.bf16 %v4019_v37  ;;  %v1482_v51 = vsub.f32 %v3057_v36, %v3441_v38  ;;  %v1673_v58 = vand.u32 2147483647, %v1481_v45  ;;  %v4025_v45 = vld [vmem:[%s4190_s7 + $0x2a8] sm:$0xff]  }
 0x140   : > { %v3080_v38 = vunpack.c.l.bf16 %v3929_v27 }
 0x141   : > { %v1852_v63 = vadd.f32 %v1851_v57, %v1661_v50  ;;  %v3445_v50 = vunpack.c.h.bf16 %v4019_v37  ;;  %v1483_v57 = vsub.f32 %v3060_v42, %v3444_v44  ;;  %v1674_v0 = vand.u32 2147483647, %v1482_v51  ;;  %v3931_v51 = vld [vmem:[%s4185_s28 + $0x2b0] sm:$0xff]  }
 0x142   : > { %v3081_v44 = vunpack.c.h.bf16 %v3929_v27 }
 0x143   : > { %v1853_v5 = vadd.f32 %v1852_v63, %v1662_v56  ;;  %v3448_v56 = vunpack.c.l.bf16 %v4020_v49  ;;  %v1484_v63 = vsub.f32 %v3061_v48, %v3445_v50  ;;  %v1675_v6 = vand.u32 2147483647, %v1483_v57  ;;  %v4026_v57 = vld [vmem:[%s4190_s7 + $0x2b0] sm:$0xff]  }
 0x144   : > { %v3084_v50 = vunpack.c.l.bf16 %v3930_v39 }
 0x145   : > { %v1854_v11 = vadd.f32 %v1853_v5, %v1663_v62  ;;  %v3449_v62 = vunpack.c.h.bf16 %v4020_v49  ;;  %v1485_v5 = vsub.f32 %v3064_v54, %v3448_v56  ;;  %v1676_v12 = vand.u32 2147483647, %v1484_v63  ;;  %v3932_v63 = vld [vmem:[%s4185_s28 + $0x2b8] sm:$0xff]  }
 0x146   : > { %v3085_v56 = vunpack.c.h.bf16 %v3930_v39 }
 0x147   : > { %v1855_v17 = vadd.f32 %v1854_v11, %v1664_v4  ;;  %v3452_v4 = vunpack.c.l.bf16 %v4021_v61  ;;  %v1486_v11 = vsub.f32 %v3065_v60, %v3449_v62  ;;  %v1677_v18 = vand.u32 2147483647, %v1485_v5  ;;  %v4027_v5 = vld [vmem:[%s4190_s7 + $0x2b8] sm:$0xff]  }
 0x148   : > { %v3088_v62 = vunpack.c.l.bf16 %v3931_v51 }
 0x149   : > { %v1856_v23 = vadd.f32 %v1855_v17, %v1665_v10  ;;  %v3453_v10 = vunpack.c.h.bf16 %v4021_v61  ;;  %v1487_v17 = vsub.f32 %v3068_v2, %v3452_v4  ;;  %v1678_v24 = vand.u32 2147483647, %v1486_v11  ;;  %v3933_v11 = vld [vmem:[%s4185_s28 + $0x2c0] sm:$0xff]  }
 0x14a   : > { %v3089_v4 = vunpack.c.h.bf16 %v3931_v51 }
 0x14b   : > { %v1857_v29 = vadd.f32 %v1856_v23, %v1666_v16  ;;  %v3456_v16 = vunpack.c.l.bf16 %v4022_v9  ;;  %v1488_v23 = vsub.f32 %v3069_v8, %v3453_v10  ;;  %v1679_v30 = vand.u32 2147483647, %v1487_v17  ;;  %v4028_v17 = vld [vmem:[%s4190_s7 + $0x2c0] sm:$0xff]  }
 0x14c   : > { %v3092_v10 = vunpack.c.l.bf16 %v3932_v63 }
 0x14d   : > { %v1858_v35 = vadd.f32 %v1857_v29, %v1667_v22  ;;  %v3457_v22 = vunpack.c.h.bf16 %v4022_v9  ;;  %v1489_v29 = vsub.f32 %v3072_v14, %v3456_v16  ;;  %v1680_v36 = vand.u32 2147483647, %v1488_v23  ;;  %v3934_v23 = vld [vmem:[%s4185_s28 + $0x2c8] sm:$0xff]  }
 0x14e   : > { %v3093_v16 = vunpack.c.h.bf16 %v3932_v63 }
 0x14f   : > { %v1859_v41 = vadd.f32 %v1858_v35, %v1668_v28  ;;  %v3460_v28 = vunpack.c.l.bf16 %v4023_v21  ;;  %v1490_v35 = vsub.f32 %v3073_v20, %v3457_v22  ;;  %v1681_v42 = vand.u32 2147483647, %v1489_v29  ;;  %v4029_v29 = vld [vmem:[%s4190_s7 + $0x2c8] sm:$0xff]  }
 0x150   : > { %v3096_v22 = vunpack.c.l.bf16 %v3933_v11 }
 0x151   : > { %v1860_v47 = vadd.f32 %v1859_v41, %v1669_v34  ;;  %v3461_v34 = vunpack.c.h.bf16 %v4023_v21  ;;  %v1491_v41 = vsub.f32 %v3076_v26, %v3460_v28  ;;  %v1682_v48 = vand.u32 2147483647, %v1490_v35  ;;  %v3935_v35 = vld [vmem:[%s4185_s28 + $0x2d0] sm:$0xff]  }
 0x152   : > { %v3097_v28 = vunpack.c.h.bf16 %v3933_v11 }
 0x153   : > { %v1861_v53 = vadd.f32 %v1860_v47, %v1670_v40  ;;  %v3464_v40 = vunpack.c.l.bf16 %v4024_v33  ;;  %v1492_v47 = vsub.f32 %v3077_v32, %v3461_v34  ;;  %v1683_v54 = vand.u32 2147483647, %v1491_v41  ;;  %v4030_v41 = vld [vmem:[%s4190_s7 + $0x2d0] sm:$0xff]  }
 0x154   : > { %v3100_v34 = vunpack.c.l.bf16 %v3934_v23 }
 0x155   : > { %v1862_v59 = vadd.f32 %v1861_v53, %v1671_v46  ;;  %v3465_v46 = vunpack.c.h.bf16 %v4024_v33  ;;  %v1493_v53 = vsub.f32 %v3080_v38, %v3464_v40  ;;  %v1684_v60 = vand.u32 2147483647, %v1492_v47  ;;  %v3936_v47 = vld [vmem:[%s4185_s28 + $0x2d8] sm:$0xff]  }
 0x156   : > { %v3101_v40 = vunpack.c.h.bf16 %v3934_v23 }
 0x157   : > { %v1863_v1 = vadd.f32 %v1862_v59, %v1672_v52  ;;  %v3468_v52 = vunpack.c.l.bf16 %v4025_v45  ;;  %v1494_v59 = vsub.f32 %v3081_v44, %v3465_v46  ;;  %v1685_v2 = vand.u32 2147483647, %v1493_v53  ;;  %v4031_v53 = vld [vmem:[%s4190_s7 + $0x2d8] sm:$0xff]  }
 0x158   : > { %v3104_v46 = vunpack.c.l.bf16 %v3935_v35 }
 0x159   : > { %v1864_v7 = vadd.f32 %v1863_v1, %v1673_v58  ;;  %v3469_v58 = vunpack.c.h.bf16 %v4025_v45  ;;  %v1495_v1 = vsub.f32 %v3084_v50, %v3468_v52  ;;  %v1686_v8 = vand.u32 2147483647, %v1494_v59  ;;  %v3937_v59 = vld [vmem:[%s4185_s28 + $0x2e0] sm:$0xff]  }
 0x15a   : > { %v3105_v52 = vunpack.c.h.bf16 %v3935_v35 }
 0x15b   : > { %v1865_v13 = vadd.f32 %v1864_v7, %v1674_v0  ;;  %v3472_v0 = vunpack.c.l.bf16 %v4026_v57  ;;  %v1496_v7 = vsub.f32 %v3085_v56, %v3469_v58  ;;  %v1687_v14 = vand.u32 2147483647, %v1495_v1  ;;  %v4032_v1 = vld [vmem:[%s4190_s7 + $0x2e0] sm:$0xff]  }
 0x15c   : > { %v3108_v58 = vunpack.c.l.bf16 %v3936_v47 }
 0x15d   : > { %v1866_v19 = vadd.f32 %v1865_v13, %v1675_v6  ;;  %v3473_v6 = vunpack.c.h.bf16 %v4026_v57  ;;  %v1497_v13 = vsub.f32 %v3088_v62, %v3472_v0  ;;  %v1688_v20 = vand.u32 2147483647, %v1496_v7  ;;  %v3938_v7 = vld [vmem:[%s4185_s28 + $0x2e8] sm:$0xff]  }
 0x15e   : > { %v3109_v0 = vunpack.c.h.bf16 %v3936_v47 }
 0x15f   : > { %v1867_v25 = vadd.f32 %v1866_v19, %v1676_v12  ;;  %v3476_v12 = vunpack.c.l.bf16 %v4027_v5  ;;  %v1498_v19 = vsub.f32 %v3089_v4, %v3473_v6  ;;  %v1689_v26 = vand.u32 2147483647, %v1497_v13  ;;  %v4033_v13 = vld [vmem:[%s4190_s7 + $0x2e8] sm:$0xff]  }
 0x160   : > { %v3112_v6 = vunpack.c.l.bf16 %v3937_v59 }
 0x161   : > { %v1868_v31 = vadd.f32 %v1867_v25, %v1677_v18  ;;  %v3477_v18 = vunpack.c.h.bf16 %v4027_v5  ;;  %v1499_v25 = vsub.f32 %v3092_v10, %v3476_v12  ;;  %v1690_v32 = vand.u32 2147483647, %v1498_v19  ;;  %v3939_v19 = vld [vmem:[%s4185_s28 + $0x2f0] sm:$0xff]  }
 0x162   : > { %v3113_v12 = vunpack.c.h.bf16 %v3937_v59 }
 0x163   : > { %v1869_v37 = vadd.f32 %v1868_v31, %v1678_v24  ;;  %v3480_v24 = vunpack.c.l.bf16 %v4028_v17  ;;  %v1500_v31 = vsub.f32 %v3093_v16, %v3477_v18  ;;  %v1691_v38 = vand.u32 2147483647, %v1499_v25  ;;  %v4034_v25 = vld [vmem:[%s4190_s7 + $0x2f0] sm:$0xff]  }
 0x164   : > { %v3116_v18 = vunpack.c.l.bf16 %v3938_v7 }
 0x165   : > { %v1870_v43 = vadd.f32 %v1869_v37, %v1679_v30  ;;  %v3481_v30 = vunpack.c.h.bf16 %v4028_v17  ;;  %v1501_v37 = vsub.f32 %v3096_v22, %v3480_v24  ;;  %v1692_v44 = vand.u32 2147483647, %v1500_v31  ;;  %v3940_v31 = vld [vmem:[%s4185_s28 + $0x2f8] sm:$0xff]  }
 0x166   : > { %v3117_v24 = vunpack.c.h.bf16 %v3938_v7  ;;  %v3125_v47 = vunpack.c.h.bf16 %v3940_v31 }
 0x167   : > { %v1871_v49 = vadd.f32 %v1870_v43, %v1680_v36  ;;  %v3484_v36 = vunpack.c.l.bf16 %v4029_v29  ;;  %v1502_v43 = vsub.f32 %v3097_v28, %v3481_v30  ;;  %v1693_v50 = vand.u32 2147483647, %v1501_v37  ;;  %v4035_v37 = vld [vmem:[%s4190_s7 + $0x2f8] sm:$0xff]  }
 0x168   : > { %v3120_v30 = vunpack.c.l.bf16 %v3939_v19 }
 0x169   : > { %v1872_v55 = vadd.f32 %v1871_v49, %v1681_v42  ;;  %v3485_v42 = vunpack.c.h.bf16 %v4029_v29  ;;  %v1503_v49 = vsub.f32 %v3100_v34, %v3484_v36  ;;  %v1694_v56 = vand.u32 2147483647, %v1502_v43 }
 0x16a   : > { %v3121_v36 = vunpack.c.h.bf16 %v3939_v19  ;;  %v3508_v43 = vunpack.c.l.bf16 %v4035_v37 }
 0x16b   : > { %v1873_v61 = vadd.f32 %v1872_v55, %v1682_v48  ;;  %v3488_v48 = vunpack.c.l.bf16 %v4030_v41  ;;  %v1504_v55 = vsub.f32 %v3101_v40, %v3485_v42  ;;  %v1695_v62 = vand.u32 2147483647, %v1503_v49 }
 0x16c   : > { %v3124_v42 = vunpack.c.l.bf16 %v3940_v31 }
 0x16d   : > { %v1874_v3 = vadd.f32 %v1873_v61, %v1683_v54  ;;  %v3489_v54 = vunpack.c.h.bf16 %v4030_v41  ;;  %v1505_v61 = vsub.f32 %v3104_v46, %v3488_v48  ;;  %v1696_v4 = vand.u32 2147483647, %v1504_v55 }
 0x16e   : > { %v3509_v48 = vunpack.c.h.bf16 %v4035_v37 }
 0x16f   : > { %v1875_v9 = vadd.f32 %v1874_v3, %v1684_v60  ;;  %v3492_v60 = vunpack.c.l.bf16 %v4031_v53  ;;  %v1506_v3 = vsub.f32 %v3105_v52, %v3489_v54  ;;  %v1697_v10 = vand.u32 2147483647, %v1505_v61 }
 0x170   : > { %v1515_v52 = vsub.f32 %v3124_v42, %v3508_v43  ;;  %v1516_v55 = vsub.f32 %v3125_v47, %v3509_v48 }
 0x171   : > { %v1876_v15 = vadd.f32 %v1875_v9, %v1685_v2  ;;  %v3493_v2 = vunpack.c.h.bf16 %v4031_v53  ;;  %v1507_v9 = vsub.f32 %v3108_v58, %v3492_v60  ;;  %v1698_v16 = vand.u32 2147483647, %v1506_v3 }
 0x172   : > { %v1707_v58 = vand.u32 2147483647, %v1515_v52  ;;  %v1708_v60 = vand.u32 2147483647, %v1516_v55 }
 0x173   : > { %v1877_v21 = vadd.f32 %v1876_v15, %v1686_v8  ;;  %v3496_v8 = vunpack.c.l.bf16 %v4032_v1  ;;  %v1508_v15 = vsub.f32 %v3109_v0, %v3493_v2  ;;  %v1699_v22 = vand.u32 2147483647, %v1507_v9 }
 0x175   : > { %v1878_v27 = vadd.f32 %v1877_v21, %v1687_v14  ;;  %v3497_v14 = vunpack.c.h.bf16 %v4032_v1  ;;  %v1509_v21 = vsub.f32 %v3112_v6, %v3496_v8  ;;  %v1700_v28 = vand.u32 2147483647, %v1508_v15  ;;  %v556_v6 = vld [vmem:[%s4673_s6] sm:$0x1] }
 0x177   : > { %v1879_v33 = vadd.f32 %v1878_v27, %v1688_v20  ;;  %v3500_v20 = vunpack.c.l.bf16 %v4033_v13  ;;  %v1510_v27 = vsub.f32 %v3113_v12, %v3497_v14  ;;  %v1701_v34 = vand.u32 2147483647, %v1509_v21 }
 0x179   : > { %v1880_v39 = vadd.f32 %v1879_v33, %v1689_v26  ;;  %v3501_v26 = vunpack.c.h.bf16 %v4033_v13  ;;  %v1511_v33 = vsub.f32 %v3116_v18, %v3500_v20  ;;  %v1702_v40 = vand.u32 2147483647, %v1510_v27 }
 0x17b   : > { %v1881_v45 = vadd.f32 %v1880_v39, %v1690_v32  ;;  %v3504_v32 = vunpack.c.l.bf16 %v4034_v25  ;;  %v1512_v39 = vsub.f32 %v3117_v24, %v3501_v26 }
 0x17d   : > { %v1882_v51 = vadd.f32 %v1881_v45, %v1691_v38  ;;  %v3505_v38 = vunpack.c.h.bf16 %v4034_v25  ;;  %v1703_v45 = vand.u32 2147483647, %v1511_v33 }
 0x17f   : > { %v1883_v57 = vadd.f32 %v1882_v51, %v1692_v44  ;;  %v1513_v44 = vsub.f32 %v3120_v30, %v3504_v32  ;;  %v1514_v49 = vsub.f32 %v3121_v36, %v3505_v38 }
 0x181   : > { %v1884_v63 = vadd.f32 %v1883_v57, %v1693_v50  ;;  %v1704_v50 = vand.u32 2147483647, %v1512_v39  ;;  %v1705_v53 = vand.u32 2147483647, %v1513_v44 }
 0x183   : > { %v1885_v5 = vadd.f32 %v1884_v63, %v1694_v56  ;;  %v1706_v56 = vand.u32 2147483647, %v1514_v49 }
 0x185   : > { %v1886_v11 = vadd.f32 %v1885_v5, %v1695_v62 }
 0x187   : > { %v1887_v17 = vadd.f32 %v1886_v11, %v1696_v4 }
 0x189   : > { %v1888_v23 = vadd.f32 %v1887_v17, %v1697_v10 }
 0x18b   : > { %v1889_v29 = vadd.f32 %v1888_v23, %v1698_v16 }
 0x18d   : > { %v1890_v35 = vadd.f32 %v1889_v29, %v1699_v22 }
 0x18f   : > { %v1891_v41 = vadd.f32 %v1890_v35, %v1700_v28 }
 0x191   : > { %v1892_v46 = vadd.f32 %v1891_v41, %v1701_v34 }
 0x193   : > { %v1893_v51 = vadd.f32 %v1892_v46, %v1702_v40 }
 0x195   : > { %v1894_v54 = vadd.f32 %v1893_v51, %v1703_v45 }
 0x197   : > { %v1895_v57 = vadd.f32 %v1894_v54, %v1704_v50 }
 0x199   : > { %v1896_v59 = vadd.f32 %v1895_v57, %v1705_v53 }
 0x19b   : > { %v1897_v61 = vadd.f32 %v1896_v59, %v1706_v56 }
 0x19d   : > { %v1898_v62 = vadd.f32 %v1897_v61, %v1707_v58 }
 0x19f   : > { %v1899_v63 = vadd.f32 %v1898_v62, %v1708_v60 }
 0x1a1   : > { %v1900_v0 = vrot.slane %v1899_v63, 4 }
 0x1a3   : > { %v1901_v1 = vadd.f32 %v1900_v0, %v1899_v63 }
 0x1a5   : > { %v1902_v2 = vrot.slane %v1901_v1, 2 }
 0x1a7   : > { %v1903_v3 = vadd.f32 %v1902_v2, %v1901_v1 }
 0x1a9   : > { %v1904_v4 = vrot.slane %v1903_v3, 1 }
 0x1ab   : > { %v1905_v5 = vadd.f32 %v1904_v4, %v1903_v3 }
 0x1ad   : > { %v1906_v7 = vmul.f32 2.5431316e-06, %v1905_v5 }
 0x1af   : > { %v1907_v8 = vadd.f32 %v1906_v7, %v556_v6 }
 0x1b1   : > { %1908 = vst [vmem:[%s4673_s6] sm:$0x1] %v1907_v8 }
 0x1b2 PF: > { %p1909_p10 = scmp.ge.s32.totalorder %s4175_s22, 2  ;;  %p1910_p11 = scmp.lt.s32.totalorder %s4175_s22, 3 }
 0x1b4   : > { %p1911_p12 = pnand %p1910_p11, %p1909_p10 }
 0x1b5   : > { %v3511_v9 = vld [vmem:[%s4669_s2] sm:$0xff] (!%p1911_p12)   ;;  %v4036_v10 = vld [vmem:[%s4669_s2 + $0x8] sm:$0xff] (!%p1911_p12)   ;;  %v4037_v16 = vld [vmem:[%s4669_s2 + $0x10] sm:$0xff] (!%p1911_p12)  }
 0x1b6   : > { %1914 = sbr.rel (%p1911_p12) target bundleno = 604 (0x25c), region = 56  ;;  %v3655_v11 = vld [vmem:[%s4670_s3] sm:$0xff] (!%p1911_p12)   ;;  %v4071_v12 = vld [vmem:[%s4670_s3 + $0x8] sm:$0xff] (!%p1911_p12)   ;;  %v3512_v13 = vunpack.c.l.bf16 (!%p1911_p12), %v3511_v9  ;;  %v3513_v14 = vunpack.c.h.bf16 (!%p1911_p12), %v3511_v9  ;;  %v3516_v15 = vunpack.c.l.bf16 (!%p1911_p12), %v4036_v10  ;;  %v4072_v20 = vld [vmem:[%s4670_s3 + $0x10] sm:$0xff] (!%p1911_p12)   ;;  %v3517_v21 = vunpack.c.h.bf16 (!%p1911_p12), %v4036_v10 }
 0x1b7   : > { %v3656_v17 = vunpack.c.l.bf16 (!%p1911_p12), %v3655_v11  ;;  %v3657_v18 = vunpack.c.h.bf16 (!%p1911_p12), %v3655_v11  ;;  %v3660_v19 = vunpack.c.l.bf16 (!%p1911_p12), %v4071_v12  ;;  %v3661_v22 = vunpack.c.h.bf16 (!%p1911_p12), %v4071_v12  ;;  %v4038_v24 = vld [vmem:[%s4669_s2 + $0x18] sm:$0xff] (!%p1911_p12)   ;;  %v4039_v34 = vld [vmem:[%s4669_s2 + $0x20] sm:$0xff] (!%p1911_p12)   ;;  %v4040_v47 = vld [vmem:[%s4669_s2 + $0x28] sm:$0xff] (!%p1911_p12)  }
 0x1b8   : > { %v3520_v23 = vunpack.c.l.bf16 (!%p1911_p12), %v4037_v16  ;;  %v3664_v25 = vunpack.c.l.bf16 (!%p1911_p12), %v4072_v20  ;;  %v4073_v26 = vld [vmem:[%s4670_s3 + $0x18] sm:$0xff] (!%p1911_p12)   ;;  %v3521_v30 = vunpack.c.h.bf16 (!%p1911_p12), %v4037_v16  ;;  %v3665_v31 = vunpack.c.h.bf16 (!%p1911_p12), %v4072_v20  ;;  %v4074_v41 = vld [vmem:[%s4670_s3 + $0x20] sm:$0xff] (!%p1911_p12)   ;;  %v4075_v53 = vld [vmem:[%s4670_s3 + $0x28] sm:$0xff] (!%p1911_p12)  }
 0x1b9   : > { %v2204_v27 = vsub.f32 (!%p1911_p12), %v3512_v13, %v3656_v17  ;;  %v2205_v28 = vsub.f32 (!%p1911_p12), %v3513_v14, %v3657_v18  ;;  %v2206_v29 = vsub.f32 (!%p1911_p12), %v3516_v15, %v3660_v19  ;;  %v2207_v32 = vsub.f32 (!%p1911_p12), %v3517_v21, %v3661_v22  ;;  %v4041_v59 = vld [vmem:[%s4669_s2 + $0x30] sm:$0xff] (!%p1911_p12)   ;;  %v4042_v7 = vld [vmem:[%s4669_s2 + $0x38] sm:$0xff] (!%p1911_p12)   ;;  %v4043_v19 = vld [vmem:[%s4669_s2 + $0x40] sm:$0xff] (!%p1911_p12)  }
 0x1ba   : > { %v3524_v33 = vunpack.c.l.bf16 (!%p1911_p12), %v4038_v24  ;;  %v3668_v35 = vunpack.c.l.bf16 (!%p1911_p12), %v4073_v26  ;;  %v2208_v36 = vsub.f32 (!%p1911_p12), %v3520_v23, %v3664_v25  ;;  %v3525_v40 = vunpack.c.h.bf16 (!%p1911_p12), %v4038_v24  ;;  %v4076_v1 = vld [vmem:[%s4670_s3 + $0x30] sm:$0xff] (!%p1911_p12)   ;;  %v4077_v13 = vld [vmem:[%s4670_s3 + $0x38] sm:$0xff] (!%p1911_p12)   ;;  %v4078_v25 = vld [vmem:[%s4670_s3 + $0x40] sm:$0xff] (!%p1911_p12)  }
 0x1bb   : > { %v2276_v37 = vand.u32 (!%p1911_p12), 2147483647, %v2204_v27  ;;  %v2277_v38 = vand.u32 (!%p1911_p12), 2147483647, %v2205_v28  ;;  %v2278_v39 = vand.u32 (!%p1911_p12), 2147483647, %v2206_v29  ;;  %v3669_v42 = vunpack.c.h.bf16 (!%p1911_p12), %v4073_v26 }
 0x1bc   : > { %v2209_v43 = vsub.f32 (!%p1911_p12), %v3521_v30, %v3665_v31  ;;  %v2279_v44 = vand.u32 (!%p1911_p12), 2147483647, %v2207_v32  ;;  %v3528_v46 = vunpack.c.l.bf16 (!%p1911_p12), %v4039_v34  ;;  %v3672_v48 = vunpack.c.l.bf16 (!%p1911_p12), %v4074_v41  ;;  %v4044_v31 = vld [vmem:[%s4669_s2 + $0x48] sm:$0xff] (!%p1911_p12)  }
 0x1bd   : > { %v2348_v45 = vadd.f32 %v2277_v38, %v2276_v37  ;;  %v2210_v49 = vsub.f32 %v3524_v33, %v3668_v35  ;;  %v2280_v50 = vand.u32 2147483647, %v2208_v36  ;;  %v3529_v52 = vunpack.c.h.bf16 %v4039_v34  ;;  %v4079_v37 = vld [vmem:[%s4670_s3 + $0x48] sm:$0xff]  }
 0x1be   : > { %v3673_v54 = vunpack.c.h.bf16 %v4074_v41  ;;  %v2211_v55 = vsub.f32 %v3525_v40, %v3669_v42  ;;  %v2281_v56 = vand.u32 2147483647, %v2209_v43  ;;  %v3532_v58 = vunpack.c.l.bf16 %v4040_v47  ;;  %v4045_v43 = vld [vmem:[%s4669_s2 + $0x50] sm:$0xff]  }
 0x1bf   : > { %v2349_v51 = vadd.f32 %v2348_v45, %v2278_v39  ;;  %v3676_v60 = vunpack.c.l.bf16 %v4075_v53  ;;  %v2212_v61 = vsub.f32 %v3528_v46, %v3672_v48  ;;  %v2282_v62 = vand.u32 2147483647, %v2210_v49  ;;  %v4080_v49 = vld [vmem:[%s4670_s3 + $0x50] sm:$0xff]  }
 0x1c0   : > { %v3533_v0 = vunpack.c.h.bf16 %v4040_v47  ;;  %v3677_v2 = vunpack.c.h.bf16 %v4075_v53  ;;  %v2213_v3 = vsub.f32 %v3529_v52, %v3673_v54  ;;  %v2283_v4 = vand.u32 2147483647, %v2211_v55  ;;  %v4046_v55 = vld [vmem:[%s4669_s2 + $0x58] sm:$0xff]  }
 0x1c1   : > { %v2350_v57 = vadd.f32 %v2349_v51, %v2279_v44  ;;  %v3536_v6 = vunpack.c.l.bf16 %v4041_v59  ;;  %v3680_v8 = vunpack.c.l.bf16 %v4076_v1  ;;  %v2214_v9 = vsub.f32 %v3532_v58, %v3676_v60 }
 0x1c2   : > { %v2284_v10 = vand.u32 2147483647, %v2212_v61  ;;  %v3537_v12 = vunpack.c.h.bf16 %v4041_v59  ;;  %v3681_v14 = vunpack.c.h.bf16 %v4076_v1  ;;  %v2215_v15 = vsub.f32 %v3533_v0, %v3677_v2  ;;  %v4081_v61 = vld [vmem:[%s4670_s3 + $0x58] sm:$0xff]  }
 0x1c3   : > { %v2351_v63 = vadd.f32 %v2350_v57, %v2280_v50  ;;  %v2285_v16 = vand.u32 2147483647, %v2213_v3  ;;  %v3540_v18 = vunpack.c.l.bf16 %v4042_v7  ;;  %v3684_v20 = vunpack.c.l.bf16 %v4077_v13  ;;  %v4047_v3 = vld [vmem:[%s4669_s2 + $0x60] sm:$0xff]  }
 0x1c4   : > { %v2216_v21 = vsub.f32 %v3536_v6, %v3680_v8  ;;  %v2286_v22 = vand.u32 2147483647, %v2214_v9  ;;  %v3541_v24 = vunpack.c.h.bf16 %v4042_v7  ;;  %v3685_v26 = vunpack.c.h.bf16 %v4077_v13  ;;  %v4082_v9 = vld [vmem:[%s4670_s3 + $0x60] sm:$0xff]  }
 0x1c5   : > { %v2352_v5 = vadd.f32 %v2351_v63, %v2281_v56  ;;  %v2217_v27 = vsub.f32 %v3537_v12, %v3681_v14  ;;  %v2287_v28 = vand.u32 2147483647, %v2215_v15  ;;  %v3544_v30 = vunpack.c.l.bf16 %v4043_v19  ;;  %v4048_v15 = vld [vmem:[%s4669_s2 + $0x68] sm:$0xff]  }
 0x1c6   : > { %v3688_v32 = vunpack.c.l.bf16 %v4078_v25  ;;  %v2218_v33 = vsub.f32 %v3540_v18, %v3684_v20  ;;  %v2288_v34 = vand.u32 2147483647, %v2216_v21  ;;  %v3545_v36 = vunpack.c.h.bf16 %v4043_v19  ;;  %v4083_v21 = vld [vmem:[%s4670_s3 + $0x68] sm:$0xff]  }
 0x1c7   : > { %v2353_v11 = vadd.f32 %v2352_v5, %v2282_v62  ;;  %v3689_v38 = vunpack.c.h.bf16 %v4078_v25  ;;  %v2219_v39 = vsub.f32 %v3541_v24, %v3685_v26  ;;  %v2289_v40 = vand.u32 2147483647, %v2217_v27  ;;  %v4049_v27 = vld [vmem:[%s4669_s2 + $0x70] sm:$0xff]  }
 0x1c8   : > { %v3548_v42 = vunpack.c.l.bf16 %v4044_v31  ;;  %v3692_v44 = vunpack.c.l.bf16 %v4079_v37  ;;  %v2220_v45 = vsub.f32 %v3544_v30, %v3688_v32  ;;  %v2290_v46 = vand.u32 2147483647, %v2218_v33  ;;  %v4084_v33 = vld [vmem:[%s4670_s3 + $0x70] sm:$0xff]  }
 0x1c9   : > { %v2354_v17 = vadd.f32 %v2353_v11, %v2283_v4  ;;  %v3549_v48 = vunpack.c.h.bf16 %v4044_v31  ;;  %v3693_v50 = vunpack.c.h.bf16 %v4079_v37  ;;  %v2221_v51 = vsub.f32 %v3545_v36, %v3689_v38 }
 0x1ca   : > { %v2291_v52 = vand.u32 2147483647, %v2219_v39  ;;  %v3552_v54 = vunpack.c.l.bf16 %v4045_v43  ;;  %v3696_v56 = vunpack.c.l.bf16 %v4080_v49  ;;  %v2222_v57 = vsub.f32 %v3548_v42, %v3692_v44  ;;  %v4050_v39 = vld [vmem:[%s4669_s2 + $0x78] sm:$0xff]  }
 0x1cb   : > { %v2355_v23 = vadd.f32 %v2354_v17, %v2284_v10  ;;  %v2292_v58 = vand.u32 2147483647, %v2220_v45  ;;  %v3553_v60 = vunpack.c.h.bf16 %v4045_v43  ;;  %v3697_v62 = vunpack.c.h.bf16 %v4080_v49  ;;  %v4085_v45 = vld [vmem:[%s4670_s3 + $0x78] sm:$0xff]  }
 0x1cc   : > { %v2223_v63 = vsub.f32 %v3549_v48, %v3693_v50  ;;  %v2293_v0 = vand.u32 2147483647, %v2221_v51  ;;  %v3556_v2 = vunpack.c.l.bf16 %v4046_v55  ;;  %v3700_v4 = vunpack.c.l.bf16 %v4081_v61  ;;  %v4051_v51 = vld [vmem:[%s4669_s2 + $0x80] sm:$0xff]  }
 0x1cd   : > { %v2356_v29 = vadd.f32 %v2355_v23, %v2285_v16  ;;  %v2224_v5 = vsub.f32 %v3552_v54, %v3696_v56  ;;  %v2294_v6 = vand.u32 2147483647, %v2222_v57  ;;  %v3557_v8 = vunpack.c.h.bf16 %v4046_v55  ;;  %v4086_v57 = vld [vmem:[%s4670_s3 + $0x80] sm:$0xff]  }
 0x1ce   : > { %v3701_v10 = vunpack.c.h.bf16 %v4081_v61  ;;  %v2225_v11 = vsub.f32 %v3553_v60, %v3697_v62  ;;  %v2295_v12 = vand.u32 2147483647, %v2223_v63  ;;  %v3560_v14 = vunpack.c.l.bf16 %v4047_v3  ;;  %v4052_v63 = vld [vmem:[%s4669_s2 + $0x88] sm:$0xff]  }
 0x1cf   : > { %v2357_v35 = vadd.f32 %v2356_v29, %v2286_v22  ;;  %v3704_v16 = vunpack.c.l.bf16 %v4082_v9  ;;  %v2226_v17 = vsub.f32 %v3556_v2, %v3700_v4  ;;  %v2296_v18 = vand.u32 2147483647, %v2224_v5  ;;  %v4087_v5 = vld [vmem:[%s4670_s3 + $0x88] sm:$0xff]  }
 0x1d0   : > { %v3561_v20 = vunpack.c.h.bf16 %v4047_v3  ;;  %v3705_v22 = vunpack.c.h.bf16 %v4082_v9  ;;  %v2227_v23 = vsub.f32 %v3557_v8, %v3701_v10  ;;  %v2297_v24 = vand.u32 2147483647, %v2225_v11  ;;  %v4053_v11 = vld [vmem:[%s4669_s2 + $0x90] sm:$0xff]  }
 0x1d1   : > { %v2358_v41 = vadd.f32 %v2357_v35, %v2287_v28  ;;  %v3564_v26 = vunpack.c.l.bf16 %v4048_v15  ;;  %v3708_v28 = vunpack.c.l.bf16 %v4083_v21  ;;  %v2228_v29 = vsub.f32 %v3560_v14, %v3704_v16 }
 0x1d2   : > { %v2298_v30 = vand.u32 2147483647, %v2226_v17  ;;  %v3565_v32 = vunpack.c.h.bf16 %v4048_v15  ;;  %v2229_v35 = vsub.f32 %v3561_v20, %v3705_v22  ;;  %v2299_v36 = vand.u32 2147483647, %v2227_v23  ;;  %v4088_v17 = vld [vmem:[%s4670_s3 + $0x90] sm:$0xff]   ;;  %v4054_v23 = vld [vmem:[%s4669_s2 + $0x98] sm:$0xff]  }
 0x1d3   : > { %v2359_v47 = vadd.f32 %v2358_v41, %v2288_v34  ;;  %v3709_v34 = vunpack.c.h.bf16 %v4083_v21  ;;  %v3568_v38 = vunpack.c.l.bf16 %v4049_v27  ;;  %v2230_v41 = vsub.f32 %v3564_v26, %v3708_v28 }
 0x1d4   : > { %v2300_v42 = vand.u32 2147483647, %v2228_v29  ;;  %v3569_v44 = vunpack.c.h.bf16 %v4049_v27  ;;  %v2301_v48 = vand.u32 2147483647, %v2229_v35  ;;  %v3572_v50 = vunpack.c.l.bf16 %v4050_v39  ;;  %v4089_v29 = vld [vmem:[%s4670_s3 + $0x98] sm:$0xff]   ;;  %v4055_v35 = vld [vmem:[%s4669_s2 + $0xa0] sm:$0xff]  }
 0x1d5   : > { %v2360_v53 = vadd.f32 %v2359_v47, %v2289_v40  ;;  %v3712_v40 = vunpack.c.l.bf16 %v4084_v33  ;;  %v2231_v47 = vsub.f32 %v3565_v32, %v3709_v34  ;;  %v2302_v54 = vand.u32 2147483647, %v2230_v41  ;;  %v4090_v41 = vld [vmem:[%s4670_s3 + $0xa0] sm:$0xff]  }
 0x1d6   : > { %v3573_v56 = vunpack.c.h.bf16 %v4050_v39  ;;  %v3576_v62 = vunpack.c.l.bf16 %v4051_v51  ;;  %v3577_v4 = vunpack.c.h.bf16 %v4051_v51  ;;  %v3580_v10 = vunpack.c.l.bf16 %v4052_v63 }
 0x1d7   : > { %v2361_v59 = vadd.f32 %v2360_v53, %v2290_v46  ;;  %v3713_v46 = vunpack.c.h.bf16 %v4084_v33  ;;  %v2232_v53 = vsub.f32 %v3568_v38, %v3712_v40  ;;  %v2303_v60 = vand.u32 2147483647, %v2231_v47  ;;  %v4056_v47 = vld [vmem:[%s4669_s2 + $0xa8] sm:$0xff]  }
 0x1d8   : > { %v3581_v16 = vunpack.c.h.bf16 %v4052_v63  ;;  %v3584_v22 = vunpack.c.l.bf16 %v4053_v11  ;;  %v3585_v28 = vunpack.c.h.bf16 %v4053_v11  ;;  %v3588_v34 = vunpack.c.l.bf16 %v4054_v23 }
 0x1d9   : > { %v2362_v1 = vadd.f32 %v2361_v59, %v2291_v52  ;;  %v3716_v52 = vunpack.c.l.bf16 %v4085_v45  ;;  %v2233_v59 = vsub.f32 %v3569_v44, %v3713_v46  ;;  %v2304_v2 = vand.u32 2147483647, %v2232_v53  ;;  %v4091_v53 = vld [vmem:[%s4670_s3 + $0xa8] sm:$0xff]  }
 0x1da   : > { %v3589_v40 = vunpack.c.h.bf16 %v4054_v23  ;;  %v3592_v46 = vunpack.c.l.bf16 %v4055_v35 }
 0x1db   : > { %v2363_v7 = vadd.f32 %v2362_v1, %v2292_v58  ;;  %v3717_v58 = vunpack.c.h.bf16 %v4085_v45  ;;  %v2234_v1 = vsub.f32 %v3572_v50, %v3716_v52  ;;  %v2305_v8 = vand.u32 2147483647, %v2233_v59  ;;  %v4057_v59 = vld [vmem:[%s4669_s2 + $0xb0] sm:$0xff]  }
 0x1dc   : > { %v3593_v52 = vunpack.c.h.bf16 %v4055_v35 }
 0x1dd   : > { %v2364_v13 = vadd.f32 %v2363_v7, %v2293_v0  ;;  %v3720_v0 = vunpack.c.l.bf16 %v4086_v57  ;;  %v2235_v7 = vsub.f32 %v3573_v56, %v3717_v58  ;;  %v2306_v14 = vand.u32 2147483647, %v2234_v1  ;;  %v4092_v1 = vld [vmem:[%s4670_s3 + $0xb0] sm:$0xff]  }
 0x1de   : > { %v3596_v58 = vunpack.c.l.bf16 %v4056_v47 }
 0x1df   : > { %v2365_v19 = vadd.f32 %v2364_v13, %v2294_v6  ;;  %v3721_v6 = vunpack.c.h.bf16 %v4086_v57  ;;  %v2236_v13 = vsub.f32 %v3576_v62, %v3720_v0  ;;  %v2307_v20 = vand.u32 2147483647, %v2235_v7  ;;  %v4058_v7 = vld [vmem:[%s4669_s2 + $0xb8] sm:$0xff]  }
 0x1e0   : > { %v3597_v0 = vunpack.c.h.bf16 %v4056_v47 }
 0x1e1   : > { %v2366_v25 = vadd.f32 %v2365_v19, %v2295_v12  ;;  %v3724_v12 = vunpack.c.l.bf16 %v4087_v5  ;;  %v2237_v19 = vsub.f32 %v3577_v4, %v3721_v6  ;;  %v2308_v26 = vand.u32 2147483647, %v2236_v13  ;;  %v4093_v13 = vld [vmem:[%s4670_s3 + $0xb8] sm:$0xff]  }
 0x1e2   : > { %v3600_v6 = vunpack.c.l.bf16 %v4057_v59 }
 0x1e3   : > { %v2367_v31 = vadd.f32 %v2366_v25, %v2296_v18  ;;  %v3725_v18 = vunpack.c.h.bf16 %v4087_v5  ;;  %v2238_v25 = vsub.f32 %v3580_v10, %v3724_v12  ;;  %v2309_v32 = vand.u32 2147483647, %v2237_v19  ;;  %v4059_v19 = vld [vmem:[%s4669_s2 + $0xc0] sm:$0xff]  }
 0x1e4   : > { %v3601_v12 = vunpack.c.h.bf16 %v4057_v59 }
 0x1e5   : > { %v2368_v37 = vadd.f32 %v2367_v31, %v2297_v24  ;;  %v3728_v24 = vunpack.c.l.bf16 %v4088_v17  ;;  %v2239_v31 = vsub.f32 %v3581_v16, %v3725_v18  ;;  %v2310_v38 = vand.u32 2147483647, %v2238_v25  ;;  %v4094_v25 = vld [vmem:[%s4670_s3 + $0xc0] sm:$0xff]  }
 0x1e6   : > { %v3604_v18 = vunpack.c.l.bf16 %v4058_v7 }
 0x1e7   : > { %v2369_v43 = vadd.f32 %v2368_v37, %v2298_v30  ;;  %v3729_v30 = vunpack.c.h.bf16 %v4088_v17  ;;  %v2240_v37 = vsub.f32 %v3584_v22, %v3728_v24  ;;  %v2311_v44 = vand.u32 2147483647, %v2239_v31  ;;  %v4060_v31 = vld [vmem:[%s4669_s2 + $0xc8] sm:$0xff]  }
 0x1e8   : > { %v3605_v24 = vunpack.c.h.bf16 %v4058_v7 }
 0x1e9   : > { %v2370_v49 = vadd.f32 %v2369_v43, %v2299_v36  ;;  %v3732_v36 = vunpack.c.l.bf16 %v4089_v29  ;;  %v2241_v43 = vsub.f32 %v3585_v28, %v3729_v30  ;;  %v2312_v50 = vand.u32 2147483647, %v2240_v37  ;;  %v4095_v37 = vld [vmem:[%s4670_s3 + $0xc8] sm:$0xff]  }
 0x1ea   : > { %v3608_v30 = vunpack.c.l.bf16 %v4059_v19 }
 0x1eb   : > { %v2371_v55 = vadd.f32 %v2370_v49, %v2300_v42  ;;  %v3733_v42 = vunpack.c.h.bf16 %v4089_v29  ;;  %v2242_v49 = vsub.f32 %v3588_v34, %v3732_v36  ;;  %v2313_v56 = vand.u32 2147483647, %v2241_v43  ;;  %v4061_v43 = vld [vmem:[%s4669_s2 + $0xd0] sm:$0xff]  }
 0x1ec   : > { %v3609_v36 = vunpack.c.h.bf16 %v4059_v19 }
 0x1ed   : > { %v2372_v61 = vadd.f32 %v2371_v55, %v2301_v48  ;;  %v3736_v48 = vunpack.c.l.bf16 %v4090_v41  ;;  %v2243_v55 = vsub.f32 %v3589_v40, %v3733_v42  ;;  %v2314_v62 = vand.u32 2147483647, %v2242_v49  ;;  %v4096_v49 = vld [vmem:[%s4670_s3 + $0xd0] sm:$0xff]  }
 0x1ee   : > { %v3612_v42 = vunpack.c.l.bf16 %v4060_v31 }
 0x1ef   : > { %v2373_v3 = vadd.f32 %v2372_v61, %v2302_v54  ;;  %v3737_v54 = vunpack.c.h.bf16 %v4090_v41  ;;  %v2244_v61 = vsub.f32 %v3592_v46, %v3736_v48  ;;  %v2315_v4 = vand.u32 2147483647, %v2243_v55  ;;  %v4062_v55 = vld [vmem:[%s4669_s2 + $0xd8] sm:$0xff]  }
 0x1f0   : > { %v3613_v48 = vunpack.c.h.bf16 %v4060_v31 }
 0x1f1   : > { %v2374_v9 = vadd.f32 %v2373_v3, %v2303_v60  ;;  %v3740_v60 = vunpack.c.l.bf16 %v4091_v53  ;;  %v2245_v3 = vsub.f32 %v3593_v52, %v3737_v54  ;;  %v2316_v10 = vand.u32 2147483647, %v2244_v61  ;;  %v4097_v61 = vld [vmem:[%s4670_s3 + $0xd8] sm:$0xff]  }
 0x1f2   : > { %v3616_v54 = vunpack.c.l.bf16 %v4061_v43 }
 0x1f3   : > { %v2375_v15 = vadd.f32 %v2374_v9, %v2304_v2  ;;  %v3741_v2 = vunpack.c.h.bf16 %v4091_v53  ;;  %v2246_v9 = vsub.f32 %v3596_v58, %v3740_v60  ;;  %v2317_v16 = vand.u32 2147483647, %v2245_v3  ;;  %v4063_v3 = vld [vmem:[%s4669_s2 + $0xe0] sm:$0xff]  }
 0x1f4   : > { %v3617_v60 = vunpack.c.h.bf16 %v4061_v43 }
 0x1f5   : > { %v2376_v21 = vadd.f32 %v2375_v15, %v2305_v8  ;;  %v3744_v8 = vunpack.c.l.bf16 %v4092_v1  ;;  %v2247_v15 = vsub.f32 %v3597_v0, %v3741_v2  ;;  %v2318_v22 = vand.u32 2147483647, %v2246_v9  ;;  %v4098_v9 = vld [vmem:[%s4670_s3 + $0xe0] sm:$0xff]  }
 0x1f6   : > { %v3620_v2 = vunpack.c.l.bf16 %v4062_v55 }
 0x1f7   : > { %v2377_v27 = vadd.f32 %v2376_v21, %v2306_v14  ;;  %v3745_v14 = vunpack.c.h.bf16 %v4092_v1  ;;  %v2248_v21 = vsub.f32 %v3600_v6, %v3744_v8  ;;  %v2319_v28 = vand.u32 2147483647, %v2247_v15  ;;  %v4064_v15 = vld [vmem:[%s4669_s2 + $0xe8] sm:$0xff]  }
 0x1f8   : > { %v3621_v8 = vunpack.c.h.bf16 %v4062_v55 }
 0x1f9   : > { %v2378_v33 = vadd.f32 %v2377_v27, %v2307_v20  ;;  %v3748_v20 = vunpack.c.l.bf16 %v4093_v13  ;;  %v2249_v27 = vsub.f32 %v3601_v12, %v3745_v14  ;;  %v2320_v34 = vand.u32 2147483647, %v2248_v21  ;;  %v4099_v21 = vld [vmem:[%s4670_s3 + $0xe8] sm:$0xff]  }
 0x1fa   : > { %v3624_v14 = vunpack.c.l.bf16 %v4063_v3 }
 0x1fb   : > { %v2379_v39 = vadd.f32 %v2378_v33, %v2308_v26  ;;  %v3749_v26 = vunpack.c.h.bf16 %v4093_v13  ;;  %v2250_v33 = vsub.f32 %v3604_v18, %v3748_v20  ;;  %v2321_v40 = vand.u32 2147483647, %v2249_v27  ;;  %v4065_v27 = vld [vmem:[%s4669_s2 + $0xf0] sm:$0xff]  }
 0x1fc   : > { %v3625_v20 = vunpack.c.h.bf16 %v4063_v3 }
 0x1fd   : > { %v2380_v45 = vadd.f32 %v2379_v39, %v2309_v32  ;;  %v3752_v32 = vunpack.c.l.bf16 %v4094_v25  ;;  %v2251_v39 = vsub.f32 %v3605_v24, %v3749_v26  ;;  %v2322_v46 = vand.u32 2147483647, %v2250_v33  ;;  %v4100_v33 = vld [vmem:[%s4670_s3 + $0xf0] sm:$0xff]  }
 0x1fe   : > { %v3628_v26 = vunpack.c.l.bf16 %v4064_v15 }
 0x1ff   : > { %v2381_v51 = vadd.f32 %v2380_v45, %v2310_v38  ;;  %v3753_v38 = vunpack.c.h.bf16 %v4094_v25  ;;  %v2252_v45 = vsub.f32 %v3608_v30, %v3752_v32  ;;  %v2323_v52 = vand.u32 2147483647, %v2251_v39  ;;  %v4066_v39 = vld [vmem:[%s4669_s2 + $0xf8] sm:$0xff]  }
 0x200   : > { %v3629_v32 = vunpack.c.h.bf16 %v4064_v15 }
 0x201   : > { %v2382_v57 = vadd.f32 %v2381_v51, %v2311_v44  ;;  %v3756_v44 = vunpack.c.l.bf16 %v4095_v37  ;;  %v2253_v51 = vsub.f32 %v3609_v36, %v3753_v38  ;;  %v2324_v58 = vand.u32 2147483647, %v2252_v45  ;;  %v4101_v45 = vld [vmem:[%s4670_s3 + $0xf8] sm:$0xff]  }
 0x202   : > { %v3632_v38 = vunpack.c.l.bf16 %v4065_v27 }
 0x203   : > { %v2383_v63 = vadd.f32 %v2382_v57, %v2312_v50  ;;  %v3757_v50 = vunpack.c.h.bf16 %v4095_v37  ;;  %v2254_v57 = vsub.f32 %v3612_v42, %v3756_v44  ;;  %v2325_v0 = vand.u32 2147483647, %v2253_v51  ;;  %v4067_v51 = vld [vmem:[%s4669_s2 + $0x100] sm:$0xff]  }
 0x204   : > { %v3633_v44 = vunpack.c.h.bf16 %v4065_v27 }
 0x205   : > { %v2384_v5 = vadd.f32 %v2383_v63, %v2313_v56  ;;  %v3760_v56 = vunpack.c.l.bf16 %v4096_v49  ;;  %v2255_v63 = vsub.f32 %v3613_v48, %v3757_v50  ;;  %v2326_v6 = vand.u32 2147483647, %v2254_v57  ;;  %v4102_v57 = vld [vmem:[%s4670_s3 + $0x100] sm:$0xff]  }
 0x206   : > { %v3636_v50 = vunpack.c.l.bf16 %v4066_v39 }
 0x207   : > { %v2385_v11 = vadd.f32 %v2384_v5, %v2314_v62  ;;  %v3761_v62 = vunpack.c.h.bf16 %v4096_v49  ;;  %v2256_v5 = vsub.f32 %v3616_v54, %v3760_v56  ;;  %v2327_v12 = vand.u32 2147483647, %v2255_v63  ;;  %v4068_v63 = vld [vmem:[%s4669_s2 + $0x108] sm:$0xff]  }
 0x208   : > { %v3637_v56 = vunpack.c.h.bf16 %v4066_v39 }
 0x209   : > { %v2386_v17 = vadd.f32 %v2385_v11, %v2315_v4  ;;  %v3764_v4 = vunpack.c.l.bf16 %v4097_v61  ;;  %v2257_v11 = vsub.f32 %v3617_v60, %v3761_v62  ;;  %v2328_v18 = vand.u32 2147483647, %v2256_v5  ;;  %v4103_v5 = vld [vmem:[%s4670_s3 + $0x108] sm:$0xff]  }
 0x20a   : > { %v3640_v62 = vunpack.c.l.bf16 %v4067_v51 }
 0x20b   : > { %v2387_v23 = vadd.f32 %v2386_v17, %v2316_v10  ;;  %v3765_v10 = vunpack.c.h.bf16 %v4097_v61  ;;  %v2258_v17 = vsub.f32 %v3620_v2, %v3764_v4  ;;  %v2329_v24 = vand.u32 2147483647, %v2257_v11  ;;  %v4069_v11 = vld [vmem:[%s4669_s2 + $0x110] sm:$0xff]  }
 0x20c   : > { %v3641_v4 = vunpack.c.h.bf16 %v4067_v51 }
 0x20d   : > { %v2388_v29 = vadd.f32 %v2387_v23, %v2317_v16  ;;  %v3768_v16 = vunpack.c.l.bf16 %v4098_v9  ;;  %v2259_v23 = vsub.f32 %v3621_v8, %v3765_v10  ;;  %v2330_v30 = vand.u32 2147483647, %v2258_v17  ;;  %v4104_v17 = vld [vmem:[%s4670_s3 + $0x110] sm:$0xff]  }
 0x20e   : > { %v3644_v10 = vunpack.c.l.bf16 %v4068_v63 }
 0x20f   : > { %v2389_v35 = vadd.f32 %v2388_v29, %v2318_v22  ;;  %v3769_v22 = vunpack.c.h.bf16 %v4098_v9  ;;  %v2260_v29 = vsub.f32 %v3624_v14, %v3768_v16  ;;  %v2331_v36 = vand.u32 2147483647, %v2259_v23  ;;  %v4070_v23 = vld [vmem:[%s4669_s2 + $0x118] sm:$0xff]  }
 0x210   : > { %v3645_v16 = vunpack.c.h.bf16 %v4068_v63  ;;  %v3653_v39 = vunpack.c.h.bf16 %v4070_v23 }
 0x211   : > { %v2390_v41 = vadd.f32 %v2389_v35, %v2319_v28  ;;  %v3772_v28 = vunpack.c.l.bf16 %v4099_v21  ;;  %v2261_v35 = vsub.f32 %v3625_v20, %v3769_v22  ;;  %v2332_v42 = vand.u32 2147483647, %v2260_v29  ;;  %v4105_v29 = vld [vmem:[%s4670_s3 + $0x118] sm:$0xff]  }
 0x212   : > { %v3648_v22 = vunpack.c.l.bf16 %v4069_v11 }
 0x213   : > { %v2391_v47 = vadd.f32 %v2390_v41, %v2320_v34  ;;  %v3773_v34 = vunpack.c.h.bf16 %v4099_v21  ;;  %v2262_v41 = vsub.f32 %v3628_v26, %v3772_v28  ;;  %v2333_v48 = vand.u32 2147483647, %v2261_v35 }
 0x214   : > { %v3649_v28 = vunpack.c.h.bf16 %v4069_v11  ;;  %v3796_v35 = vunpack.c.l.bf16 %v4105_v29 }
 0x215   : > { %v2392_v53 = vadd.f32 %v2391_v47, %v2321_v40  ;;  %v3776_v40 = vunpack.c.l.bf16 %v4100_v33  ;;  %v2263_v47 = vsub.f32 %v3629_v32, %v3773_v34  ;;  %v2334_v54 = vand.u32 2147483647, %v2262_v41 }
 0x216   : > { %v3652_v34 = vunpack.c.l.bf16 %v4070_v23 }
 0x217   : > { %v2393_v59 = vadd.f32 %v2392_v53, %v2322_v46  ;;  %v3777_v46 = vunpack.c.h.bf16 %v4100_v33  ;;  %v2264_v53 = vsub.f32 %v3632_v38, %v3776_v40  ;;  %v2335_v60 = vand.u32 2147483647, %v2263_v47 }
 0x218   : > { %v3797_v40 = vunpack.c.h.bf16 %v4105_v29 }
 0x219   : > { %v2394_v1 = vadd.f32 %v2393_v59, %v2323_v52  ;;  %v3780_v52 = vunpack.c.l.bf16 %v4101_v45  ;;  %v2265_v59 = vsub.f32 %v3633_v44, %v3777_v46  ;;  %v2336_v2 = vand.u32 2147483647, %v2264_v53 }
 0x21a   : > { %v2274_v44 = vsub.f32 %v3652_v34, %v3796_v35  ;;  %v2275_v47 = vsub.f32 %v3653_v39, %v3797_v40 }
 0x21b   : > { %v2395_v7 = vadd.f32 %v2394_v1, %v2324_v58  ;;  %v3781_v58 = vunpack.c.h.bf16 %v4101_v45  ;;  %v2266_v1 = vsub.f32 %v3636_v50, %v3780_v52  ;;  %v2337_v8 = vand.u32 2147483647, %v2265_v59 }
 0x21c   : > { %v2346_v50 = vand.u32 2147483647, %v2274_v44  ;;  %v2347_v52 = vand.u32 2147483647, %v2275_v47 }
 0x21d   : > { %v2396_v13 = vadd.f32 %v2395_v7, %v2325_v0  ;;  %v3784_v0 = vunpack.c.l.bf16 %v4102_v57  ;;  %v2267_v7 = vsub.f32 %v3637_v56, %v3781_v58  ;;  %v2338_v14 = vand.u32 2147483647, %v2266_v1 }
 0x21f   : > { %v2397_v19 = vadd.f32 %v2396_v13, %v2326_v6  ;;  %v3785_v6 = vunpack.c.h.bf16 %v4102_v57  ;;  %v2268_v13 = vsub.f32 %v3640_v62, %v3784_v0  ;;  %v2339_v20 = vand.u32 2147483647, %v2267_v7  ;;  %v1915_v62 = vld [vmem:[%s4673_s6] sm:$0x1] }
 0x221   : > { %v2398_v25 = vadd.f32 %v2397_v19, %v2327_v12  ;;  %v3788_v12 = vunpack.c.l.bf16 %v4103_v5  ;;  %v2269_v19 = vsub.f32 %v3641_v4, %v3785_v6  ;;  %v2340_v26 = vand.u32 2147483647, %v2268_v13 }
 0x223   : > { %v2399_v31 = vadd.f32 %v2398_v25, %v2328_v18  ;;  %v3789_v18 = vunpack.c.h.bf16 %v4103_v5  ;;  %v2270_v25 = vsub.f32 %v3644_v10, %v3788_v12  ;;  %v2341_v32 = vand.u32 2147483647, %v2269_v19 }
 0x225   : > { %v2400_v37 = vadd.f32 %v2399_v31, %v2329_v24  ;;  %v3792_v24 = vunpack.c.l.bf16 %v4104_v17  ;;  %v2271_v31 = vsub.f32 %v3645_v16, %v3789_v18 }
 0x227   : > { %v2401_v43 = vadd.f32 %v2400_v37, %v2330_v30  ;;  %v3793_v30 = vunpack.c.h.bf16 %v4104_v17  ;;  %v2342_v37 = vand.u32 2147483647, %v2270_v25 }
 0x229   : > { %v2402_v49 = vadd.f32 %v2401_v43, %v2331_v36  ;;  %v2272_v36 = vsub.f32 %v3648_v22, %v3792_v24  ;;  %v2273_v41 = vsub.f32 %v3649_v28, %v3793_v30 }
 0x22b   : > { %v2403_v55 = vadd.f32 %v2402_v49, %v2332_v42  ;;  %v2343_v42 = vand.u32 2147483647, %v2271_v31  ;;  %v2344_v45 = vand.u32 2147483647, %v2272_v36 }
 0x22d   : > { %v2404_v61 = vadd.f32 %v2403_v55, %v2333_v48  ;;  %v2345_v48 = vand.u32 2147483647, %v2273_v41 }
 0x22f   : > { %v2405_v3 = vadd.f32 %v2404_v61, %v2334_v54 }
 0x231   : > { %v2406_v9 = vadd.f32 %v2405_v3, %v2335_v60 }
 0x233   : > { %v2407_v15 = vadd.f32 %v2406_v9, %v2336_v2 }
 0x235   : > { %v2408_v21 = vadd.f32 %v2407_v15, %v2337_v8 }
 0x237   : > { %v2409_v27 = vadd.f32 %v2408_v21, %v2338_v14 }
 0x239   : > { %v2410_v33 = vadd.f32 %v2409_v27, %v2339_v20 }
 0x23b   : > { %v2411_v38 = vadd.f32 %v2410_v33, %v2340_v26 }
 0x23d   : > { %v2412_v43 = vadd.f32 %v2411_v38, %v2341_v32 }
 0x23f   : > { %v2413_v46 = vadd.f32 %v2412_v43, %v2342_v37 }
 0x241   : > { %v2414_v49 = vadd.f32 %v2413_v46, %v2343_v42 }
 0x243   : > { %v2415_v51 = vadd.f32 %v2414_v49, %v2344_v45 }
 0x245   : > { %v2416_v53 = vadd.f32 %v2415_v51, %v2345_v48 }
 0x247   : > { %v2417_v54 = vadd.f32 %v2416_v53, %v2346_v50 }
 0x249   : > { %v2418_v55 = vadd.f32 %v2417_v54, %v2347_v52 }
 0x24b   : > { %v2419_v56 = vrot.slane %v2418_v55, 4 }
 0x24d   : > { %v2420_v57 = vadd.f32 %v2419_v56, %v2418_v55 }
 0x24f   : > { %v2421_v58 = vrot.slane %v2420_v57, 2 }
 0x251   : > { %v2422_v59 = vadd.f32 %v2421_v58, %v2420_v57 }
 0x253   : > { %v2423_v60 = vrot.slane %v2422_v59, 1 }
 0x255   : > { %v2424_v61 = vadd.f32 %v2423_v60, %v2422_v59 }
 0x257   : > { %v2425_v63 = vmul.f32 1.3563368e-05, %v2424_v61 }
 0x259   : > { %v2426_v0 = vadd.f32 %v2425_v63, %v1915_v62 }
 0x25b   : > { %2427 = vst [vmem:[%s4673_s6] sm:$0x1] %v2426_v0 }
 0x25c PF: > { %p2428_p13 = scmp.ge.s32.totalorder %s4175_s22, 3  ;;  %p2429_p0 = scmp.lt.s32.totalorder %s4175_s22, 4 }
 0x25e   : > { %p2430_p1 = pnand %p2429_p0, %p2428_p13 }
 0x25f   : > { %v3799_v1 = vld [vmem:[%s4671_s4] sm:$0xff] (!%p2430_p1)   ;;  %v4106_v2 = vld [vmem:[%s4671_s4 + $0x8] sm:$0xff] (!%p2430_p1)   ;;  %v4107_v9 = vld [vmem:[%s4671_s4 + $0x10] sm:$0xff] (!%p2430_p1)  }
 0x260   : > { %2433 = sbr.rel (%p2430_p1) target bundleno = 654 (0x28e), region = 60  ;;  %v3823_v3 = vld [vmem:[%s4672_s5] sm:$0xff] (!%p2430_p1)   ;;  %v4111_v4 = vld [vmem:[%s4672_s5 + $0x8] sm:$0xff] (!%p2430_p1)   ;;  %v3800_v5 = vunpack.c.l.bf16 (!%p2430_p1), %v3799_v1  ;;  %v3801_v6 = vunpack.c.h.bf16 (!%p2430_p1), %v3799_v1  ;;  %v3804_v7 = vunpack.c.l.bf16 (!%p2430_p1), %v4106_v2  ;;  %v3805_v8 = vunpack.c.h.bf16 (!%p2430_p1), %v4106_v2  ;;  %v4112_v10 = vld [vmem:[%s4672_s5 + $0x10] sm:$0xff] (!%p2430_p1)  }
 0x261   : > { %v3824_v11 = vunpack.c.l.bf16 (!%p2430_p1), %v3823_v3  ;;  %v3825_v12 = vunpack.c.h.bf16 (!%p2430_p1), %v3823_v3  ;;  %v3828_v13 = vunpack.c.l.bf16 (!%p2430_p1), %v4111_v4  ;;  %v3829_v14 = vunpack.c.h.bf16 (!%p2430_p1), %v4111_v4  ;;  %v4108_v16 = vld [vmem:[%s4671_s4 + $0x18] sm:$0xff] (!%p2430_p1)   ;;  %v4109_v26 = vld [vmem:[%s4671_s4 + $0x20] sm:$0xff] (!%p2430_p1)   ;;  %v4110_v39 = vld [vmem:[%s4671_s4 + $0x28] sm:$0xff] (!%p2430_p1)  }
 0x262   : > { %v3808_v15 = vunpack.c.l.bf16 (!%p2430_p1), %v4107_v9  ;;  %v3832_v17 = vunpack.c.l.bf16 (!%p2430_p1), %v4112_v10  ;;  %v4113_v18 = vld [vmem:[%s4672_s5 + $0x18] sm:$0xff] (!%p2430_p1)   ;;  %v3809_v22 = vunpack.c.h.bf16 (!%p2430_p1), %v4107_v9  ;;  %v3833_v23 = vunpack.c.h.bf16 (!%p2430_p1), %v4112_v10  ;;  %v4114_v33 = vld [vmem:[%s4672_s5 + $0x20] sm:$0xff] (!%p2430_p1)   ;;  %v4115_v45 = vld [vmem:[%s4672_s5 + $0x28] sm:$0xff] (!%p2430_p1)  }
 0x263   : > { %v2483_v19 = vsub.f32 (!%p2430_p1), %v3800_v5, %v3824_v11  ;;  %v2484_v20 = vsub.f32 (!%p2430_p1), %v3801_v6, %v3825_v12  ;;  %v2485_v21 = vsub.f32 (!%p2430_p1), %v3804_v7, %v3828_v13  ;;  %v2486_v24 = vsub.f32 (!%p2430_p1), %v3805_v8, %v3829_v14  ;;  %v2434_v14 = vld [vmem:[%s4673_s6] sm:$0x1] (!%p2430_p1) }
 0x264   : > { %v3812_v25 = vunpack.c.l.bf16 (!%p2430_p1), %v4108_v16  ;;  %v3836_v27 = vunpack.c.l.bf16 (!%p2430_p1), %v4113_v18  ;;  %v2487_v28 = vsub.f32 (!%p2430_p1), %v3808_v15, %v3832_v17  ;;  %v3813_v32 = vunpack.c.h.bf16 (!%p2430_p1), %v4108_v16 }
 0x265   : > { %v2495_v29 = vand.u32 (!%p2430_p1), 2147483647, %v2483_v19  ;;  %v2496_v30 = vand.u32 (!%p2430_p1), 2147483647, %v2484_v20  ;;  %v2497_v31 = vand.u32 (!%p2430_p1), 2147483647, %v2485_v21  ;;  %v3837_v34 = vunpack.c.h.bf16 (!%p2430_p1), %v4113_v18 }
 0x266   : > { %v2488_v35 = vsub.f32 (!%p2430_p1), %v3809_v22, %v3833_v23  ;;  %v2498_v36 = vand.u32 (!%p2430_p1), 2147483647, %v2486_v24  ;;  %v3816_v38 = vunpack.c.l.bf16 (!%p2430_p1), %v4109_v26  ;;  %v3840_v40 = vunpack.c.l.bf16 (!%p2430_p1), %v4114_v33 }
 0x267   : > { %v2507_v37 = vadd.f32 %v2496_v30, %v2495_v29  ;;  %v2489_v41 = vsub.f32 %v3812_v25, %v3836_v27  ;;  %v2499_v42 = vand.u32 2147483647, %v2487_v28  ;;  %v3817_v44 = vunpack.c.h.bf16 %v4109_v26 }
 0x268   : > { %v3841_v46 = vunpack.c.h.bf16 %v4114_v33  ;;  %v2490_v47 = vsub.f32 %v3813_v32, %v3837_v34  ;;  %v2500_v48 = vand.u32 2147483647, %v2488_v35  ;;  %v3820_v50 = vunpack.c.l.bf16 %v4110_v39 }
 0x269   : > { %v2508_v43 = vadd.f32 %v2507_v37, %v2497_v31  ;;  %v3844_v51 = vunpack.c.l.bf16 %v4115_v45  ;;  %v2491_v52 = vsub.f32 %v3816_v38, %v3840_v40  ;;  %v2501_v53 = vand.u32 2147483647, %v2489_v41 }
 0x26a   : > { %v3821_v55 = vunpack.c.h.bf16 %v4110_v39  ;;  %v3845_v56 = vunpack.c.h.bf16 %v4115_v45  ;;  %v2492_v57 = vsub.f32 %v3817_v44, %v3841_v46  ;;  %v2502_v58 = vand.u32 2147483647, %v2490_v47 }
 0x26b   : > { %v2509_v49 = vadd.f32 %v2508_v43, %v2498_v36  ;;  %v2493_v60 = vsub.f32 %v3820_v50, %v3844_v51  ;;  %v2503_v61 = vand.u32 2147483647, %v2491_v52 }
 0x26c   : > { %v2494_v63 = vsub.f32 %v3821_v55, %v3845_v56  ;;  %v2504_v0 = vand.u32 2147483647, %v2492_v57 }
 0x26d   : > { %v2510_v54 = vadd.f32 %v2509_v49, %v2499_v42  ;;  %v2505_v2 = vand.u32 2147483647, %v2493_v60 }
 0x26e   : > { %v2506_v4 = vand.u32 2147483647, %v2494_v63 }
 0x26f   : > { %v2511_v59 = vadd.f32 %v2510_v54, %v2500_v48 }
 0x271   : > { %v2512_v62 = vadd.f32 %v2511_v59, %v2501_v53 }
 0x273   : > { %v2513_v1 = vadd.f32 %v2512_v62, %v2502_v58 }
 0x275   : > { %v2514_v3 = vadd.f32 %v2513_v1, %v2503_v61 }
 0x277   : > { %v2515_v5 = vadd.f32 %v2514_v3, %v2504_v0 }
 0x279   : > { %v2516_v6 = vadd.f32 %v2515_v5, %v2505_v2 }
 0x27b   : > { %v2517_v7 = vadd.f32 %v2516_v6, %v2506_v4 }
 0x27d   : > { %v2518_v8 = vrot.slane %v2517_v7, 4 }
 0x27f   : > { %v2519_v9 = vadd.f32 %v2518_v8, %v2517_v7 }
 0x281   : > { %v2520_v10 = vrot.slane %v2519_v9, 2 }
 0x283   : > { %v2521_v11 = vadd.f32 %v2520_v10, %v2519_v9 }
 0x285   : > { %v2522_v12 = vrot.slane %v2521_v11, 1 }
 0x287   : > { %v2523_v13 = vadd.f32 %v2522_v12, %v2521_v11 }
 0x289   : > { %v2524_v15 = vmul.f32 8.138021e-05, %v2523_v13 }
 0x28b   : > { %v2525_v16 = vadd.f32 %v2524_v15, %v2434_v14 }
 0x28d   : > { %2526 = vst [vmem:[%s4673_s6] sm:$0x1] %v2525_v16 }
 0x28e PF: > { %s16_s21 = sadd.s32 1, %s4131_s21  }
 0x28f   : > { %p13_p2 = scmp.ge.s32.totalorder %s16_s21, 6  }
 0x291   :  { %15 = sbr.rel (!%p13_p2) target bundleno = 1 (0x1), region = 101 }

</bundles_post_ra>
